<compile_context>
chip_gen: v5e
topology: v5e:2x2
jax: 0.10.0
libtpu: 0.0.40
codegen_flags: <defaults>
</compile_context>

<pallas_src>
import math
from functools import partial

import jax
import jax.numpy as jnp
from jax import lax
from jax.experimental import pallas as pl
from jax.experimental.pallas import tpu as pltpu


# ----------------------------------------------------------------------------- kernel

def gatne_kernel(adjcat_ref, srcbd_ref, base_ref, w1bd_ref, w2b_ref, wf_ref,
                 out_ref, *, T, U, D):
    # 1) fused per-edge-type neighbor aggregation: ONE MXU matmul.
    #    adj_cat (tb, T*S) @ blockdiag(src) (T*S, T*U) -> (tb, T*U) f32 slab whose column
    #    block t equals sum_s adj[t,b,s] * src_type[t,s,:].
    nte = jnp.dot(adjcat_ref[...], srcbd_ref[...],
                  preferred_element_type=jnp.float32)              # (tb, T*U) f32

    # 2) fused attention logits: two MXU matmuls (attention weights kept in f32).
    h = jnp.tanh(jnp.dot(nte, w1bd_ref[...],
                         preferred_element_type=jnp.float32))      # (tb, T*A) f32
    scores = jnp.dot(h, w2b_ref[...],
                     preferred_element_type=jnp.float32)           # (tb, T)   f32

    # 3) softmax over edge types — pairwise max/add on register slices (VPU/EUP only).
    cols = [scores[:, t:t + 1] for t in range(T)]                  # T x (tb, 1)
    m = cols[0]
    for t in range(1, T):
        m = jnp.maximum(m, cols[t])
    exps = [jnp.exp(c - m) for c in cols]
    denom = exps[0]
    for t in range(1, T):
        denom = denom + exps[t]
    inv_denom = pl.reciprocal(denom, approx=True)                  # EUP

    # 4) attention-weighted combination of the per-type aggregates (registers, no scratch).
    attended = (exps[0] * inv_denom) * nte[:, 0:U]
    for t in range(1, T):
        attended = attended + (exps[t] * inv_denom) * nte[:, t * U:(t + 1) * U]  # (tb, U)

    # 5) fused per-type transform: ONE (tb,U)x(U,T*D) MXU matmul -> lane-dense slab.
    fused = jnp.dot(attended.astype(wf_ref.dtype), wf_ref[...],
                    preferred_element_type=jnp.float32)            # (tb, T*D) f32
    base = base_ref[...]                                           # (tb, D)   f32

    # 6) add base embedding and L2-normalize each 128-wide D chunk (F.normalize, eps=1e-12),
    #    writing full (tb, D) aligned chunks (unmasked stores).
    for t in range(T):
        ne = base + fused[:, t * D:(t + 1) * D]
        ssq = jnp.sum(ne * ne, axis=-1, keepdims=True)
        inv = lax.rsqrt(jnp.maximum(ssq, 1e-24))      # == 1/max(||ne||, 1e-12)
        out_ref[:, t * D:(t + 1) * D] = (ne * inv).astype(out_ref.dtype)


# ----------------------------------------------------------------------------- host glue

def _block_diag(blocks):
    """(T, R, C) -> block-diagonal (T*R, T*C)."""
    T, R, C = blocks.shape
    eye = jnp.eye(T, dtype=blocks.dtype)
    return (blocks[:, :, None, :] * eye[:, None, :, None]).reshape(T * R, T * C)


def _pick_tb(B, max_tb=512):
    """Largest batch tile <= max_tb that divides B, is a sublane multiple, and keeps the
    grid extent >= 2 (even when possible) so both v7x TensorCores get balanced work."""
    cands = [t for t in range(8, min(max_tb, B) + 1, 8) if B % t == 0]
    if not cands:
        return B
    two_core = [t for t in cands if B // t >= 2]
    even = [t for t in two_core if (B // t) % 2 == 0]
    pool = even or two_core or cands
    return max(pool)


def gatne_forward(adj, src_type, base, trans_w, trans_w_s1, trans_w_s2, *,
                  tb=None, compute_dtype=jnp.bfloat16, out_dtype=jnp.float32,
                  single_buffer_weights=False, vmem_limit_bytes=None):
    """adj: (T,B,S) dense per-edge-type adjacency; src_type: (T,S,U); base: (B,D);
    trans_w: (T,U,D); trans_w_s1: (T,U,A); trans_w_s2: (T,A,1).  Returns (B,T,D)."""
    T, B, S = adj.shape
    U = src_type.shape[-1]
    D = trans_w.shape[-1]
    A = trans_w_s1.shape[-1]
    assert base.shape == (B, D)

    if tb is None:
        tb = _pick_tb(B)
    assert B % tb == 0, "batch must be a multiple of the batch tile"

    f32 = jnp.float32

    # ---- host-side fusion into concatenated / block-diagonal operands -------------------
    # MXU operands may be bf16 (adjacency is 0/1 so exact); accumulation and all
    # elementwise math stay f32.
    # TODO(synk): for very large S or T the block-diagonal operands grow as T^2*S*U — fall
    # back to a per-type loop with VMEM scratch there (and zero-pad S/U to 128 multiples).
    adj_cat = jnp.transpose(adj, (1, 0, 2)).reshape(B, T * S).astype(compute_dtype)
    src_bd = _block_diag(src_type.astype(compute_dtype))                    # (T*S, T*U)
    w1_bd = _block_diag(trans_w_s1.astype(f32))                             # (T*U, T*A)
    eyeT = jnp.eye(T, dtype=f32)
    w2_b = (trans_w_s2.astype(f32)[:, :, 0:1] * eyeT[:, None, :]).reshape(T * A, T)
    w_fused = jnp.transpose(trans_w, (1, 0, 2)).reshape(U, T * D).astype(compute_dtype)
    base_c = base.astype(f32)

    grid = (B // tb,)

    def _resident(shape):
        nd = len(shape)
        imap = lambda i, _nd=nd: (0,) * _nd
        kwargs = {}
        if single_buffer_weights:
            # v7x VMEM lever: constant-index weights gain nothing from double buffering.
            kwargs["pipeline_mode"] = pl.Buffered(1)
        return pl.BlockSpec(shape, imap, **kwargs)

    in_specs = [
        pl.BlockSpec((tb, T * S), lambda i: (i, 0)),   # concatenated adjacency tile
        _resident((T * S, T * U)),                     # block-diag src type-embeddings
        pl.BlockSpec((tb, D), lambda i: (i, 0)),       # dst base embeddings tile
        _resident((T * U, T * A)),                     # block-diag attention W_s1 (f32)
        _resident((T * A, T)),                         # block attention W_s2      (f32)
        _resident((U, T * D)),                         # fused transform weight
    ]
    out_specs = pl.BlockSpec((tb, T * D), lambda i: (i, 0))   # lane/sublane-dense slab

    flops = (2 * B * (T * S) * (T * U)      # fused aggregation (block-diag K)
             + 2 * B * (T * U) * (T * A)    # fused attention s1
             + 2 * B * (T * A) * T          # fused attention s2
             + 2 * B * U * (T * D))         # fused transform
    transcendentals = B * T * A + B * T + 2 * B       # tanh, exp, reciprocal, rsqrt
    bytes_accessed = (adj_cat.size * adj_cat.dtype.itemsize
                      + src_bd.size * src_bd.dtype.itemsize
                      + base_c.size * 4
                      + w1_bd.size * 4 + w2_b.size * 4
                      + w_fused.size * w_fused.dtype.itemsize
                      + B * T * D * jnp.dtype(out_dtype).itemsize)

    cp_kwargs = dict(dimension_semantics=("parallel",))
    if vmem_limit_bytes is not None:
        cp_kwargs["vmem_limit_bytes"] = vmem_limit_bytes

    out_flat = pl.pallas_call(
        partial(gatne_kernel, T=T, U=U, D=D),
        out_shape=jax.ShapeDtypeStruct((B, T * D), out_dtype),
        grid_spec=pltpu.PrefetchScalarGridSpec(
            num_scalar_prefetch=0,
            grid=grid,
            in_specs=in_specs,
            out_specs=out_specs,
        ),
        compiler_params=pltpu.CompilerParams(**cp_kwargs),
        cost_estimate=pl.CostEstimate(flops=flops,
                                      transcendentals=transcendentals,
                                      bytes_accessed=bytes_accessed),
    )(adj_cat, src_bd, base_c, w1_bd, w2_b, w_fused)

    return out_flat.reshape(B, T, D)


# ----------------------------------------------------------------------------- reference

def reference(adj, src_type, base, w, w1, w2):
    hi = lax.Precision.HIGHEST
    nte = jnp.einsum('tbs,tsu->btu', adj, src_type, precision=hi)
    h = jnp.tanh(jnp.einsum('btu,tua->bta', nte, w1, precision=hi))
    scores = jnp.einsum('bta,ta->bt', h, w2[:, :, 0], precision=hi)
    att = jax.nn.softmax(scores, axis=1)
    attended = jnp.einsum('bt,btu->bu', att, nte, precision=hi)
    ne = base[:, None, :] + jnp.einsum('bu,tud->btd', attended, w, precision=hi)
    norm = jnp.maximum(jnp.linalg.norm(ne, axis=-1, keepdims=True), 1e-12)
    return ne / norm


if __name__ == "__main__":
    # Small synthetic configuration consistent with DGLGATNE.__init__
    num_nodes = 64          # N
    embedding_size = 128    # D
    embedding_u_size = 32   # U
    edge_type_count = 2     # T
    dim_a = 16              # A
    num_src = 32            # S  (block src nodes)
    batch_size = 256        # B  (auto tb=128 -> grid extent 2, both v7x cores busy)

    key = jax.random.PRNGKey(0)
    k1, k2, k3, k4, k5, k6, k7, k8 = jax.random.split(key, 8)

    # Parameters (deterministic init mirroring reset_parameters)
    node_embeddings = jax.random.uniform(
        k1, (num_nodes, embedding_size), jnp.float32, -1.0, 1.0)
    node_type_embeddings = jax.random.uniform(
        k2, (num_nodes * edge_type_count, embedding_u_size), jnp.float32, -1.0, 1.0)
    std = 1.0 / math.sqrt(embedding_size)
    trans_weights = std * jax.random.normal(
        k3, (edge_type_count, embedding_u_size, embedding_size), jnp.float32)
    trans_weights_s1 = std * jax.random.normal(
        k4, (edge_type_count, embedding_u_size, dim_a), jnp.float32)
    trans_weights_s2 = std * jax.random.normal(
        k5, (edge_type_count, dim_a, 1), jnp.float32)    # PyTorch layout (T, A, 1)

    # Synthetic DGL block: src/dst node ids + dense per-edge-type adjacency
    input_nodes = jax.random.randint(k6, (num_src,), 0, num_nodes)       # src node ids
    output_nodes = jax.random.randint(k7, (batch_size,), 0, num_nodes)   # dst node ids
    adj = jax.random.bernoulli(
        k8, 0.3, (edge_type_count, batch_size, num_src)).astype(jnp.float32)

    # Embedding-table gathers (glue, not the hot path)
    src_type_idx = (input_nodes[None, :] * edge_type_count
                    + jnp.arange(edge_type_count)[:, None])              # (T, S)
    src_type_embed = node_type_embeddings[src_type_idx]                  # (T, S, U)
    base_embed = node_embeddings[output_nodes]                           # (B, D)

    # --- default run (bf16 MXU operands; elementwise math stays f32) ---
    out16 = jax.block_until_ready(
        gatne_forward(adj, src_type_embed, base_embed,
                      trans_weights, trans_weights_s1, trans_weights_s2))
    assert out16.shape == (batch_size, edge_type_count, embedding_size)
    bf = lambda x: x.astype(jnp.bfloat16).astype(jnp.float32)
    ref16 = jax.block_until_ready(
        reference(bf(adj), bf(src_type_embed), base_embed,
                  bf(trans_weights), trans_weights_s1, trans_weights_s2))
    assert jnp.allclose(out16, ref16, atol=5e-3, rtol=5e-3)

    # --- float32 parity run (exact MXU operands) ---
    out32 = jax.block_until_ready(
        gatne_forward(adj, src_type_embed, base_embed,
                      trans_weights, trans_weights_s1, trans_weights_s2,
                      compute_dtype=jnp.float32))
    ref32 = jax.block_until_ready(
        reference(adj, src_type_embed, base_embed,
                  trans_weights, trans_weights_s1, trans_weights_s2))
    # tolerance absorbs the approximate EUP reciprocal/rsqrt in the kernel
    assert jnp.allclose(out32, ref32, atol=2e-3, rtol=2e-3)

    print("KERNEL_OK")
</pallas_src>

<mosaic_0001>
module attributes {stable_mosaic.version = 11 : i64} {
  func.func @gatne_kernel(%arg0: i32, %arg1: memref<128x64xbf16, #tpu.memory_space<vmem>>, %arg2: memref<64x64xbf16, #tpu.memory_space<vmem>>, %arg3: memref<128x128xf32, #tpu.memory_space<vmem>>, %arg4: memref<64x32xf32, #tpu.memory_space<vmem>>, %arg5: memref<32x2xf32, #tpu.memory_space<vmem>>, %arg6: memref<32x256xbf16, #tpu.memory_space<vmem>>, %arg7: memref<128x256xf32, #tpu.memory_space<vmem>>) attributes {dimension_semantics = [#tpu.dimension_semantics<parallel>], iteration_bounds = array<i64: 2>, scalar_prefetch = 0 : i64, scratch_operands = 0 : i64, tpu.core_type = #tpu.core_type<tc>, window_params = [{transform_indices = @transform_0, window_bounds = array<i64: 128, 64>}, {pipeline_mode = #tpu.pipeline_mode<synchronous>, transform_indices = @transform_1, window_bounds = array<i64: 64, 64>}, {transform_indices = @transform_2, window_bounds = array<i64: 128, 128>}, {pipeline_mode = #tpu.pipeline_mode<synchronous>, transform_indices = @transform_3, window_bounds = array<i64: 64, 32>}, {pipeline_mode = #tpu.pipeline_mode<synchronous>, transform_indices = @transform_4, window_bounds = array<i64: 32, 2>}, {pipeline_mode = #tpu.pipeline_mode<synchronous>, transform_indices = @transform_5, window_bounds = array<i64: 32, 256>}, {transform_indices = @transform_6, window_bounds = array<i64: 128, 256>}]} {
    %c0 = arith.constant 0 : index
    %c0_0 = arith.constant 0 : index
    %0 = vector.load %arg1[%c0, %c0_0] : memref<128x64xbf16, #tpu.memory_space<vmem>>, vector<128x64xbf16>
    %c0_1 = arith.constant 0 : index
    %c0_2 = arith.constant 0 : index
    %1 = vector.load %arg2[%c0_1, %c0_2] : memref<64x64xbf16, #tpu.memory_space<vmem>>, vector<64x64xbf16>
    %cst = arith.constant dense<0.000000e+00> : vector<128x64xf32>
    %2 = tpu.matmul %0, %1, %cst {dimension_numbers = #tpu.dot_dimension_numbers<[1], [0], [0], [1], [0, 0, 1, 1], [], []>} : vector<128x64xbf16>, vector<64x64xbf16>, vector<128x64xf32> -> vector<128x64xf32>
    %c0_3 = arith.constant 0 : index
    %c0_4 = arith.constant 0 : index
    %3 = vector.load %arg4[%c0_3, %c0_4] : memref<64x32xf32, #tpu.memory_space<vmem>>, vector<64x32xf32>
    %cst_5 = arith.constant dense<0.000000e+00> : vector<128x32xf32>
    %4 = tpu.matmul %2, %3, %cst_5 {dimension_numbers = #tpu.dot_dimension_numbers<[1], [0], [0], [1], [0, 0, 1, 1], [], []>} : vector<128x64xf32>, vector<64x32xf32>, vector<128x32xf32> -> vector<128x32xf32>
    %5 = math.tanh %4 : vector<128x32xf32>
    %c0_6 = arith.constant 0 : index
    %c0_7 = arith.constant 0 : index
    %6 = vector.load %arg5[%c0_6, %c0_7] : memref<32x2xf32, #tpu.memory_space<vmem>>, vector<32x2xf32>
    %cst_8 = arith.constant dense<0.000000e+00> : vector<128x2xf32>
    %7 = tpu.matmul %5, %6, %cst_8 {dimension_numbers = #tpu.dot_dimension_numbers<[1], [0], [0], [1], [0, 0, 1, 1], [], []>} : vector<128x32xf32>, vector<32x2xf32>, vector<128x2xf32> -> vector<128x2xf32>
    %8 = vector.extract_strided_slice %7 {offsets = [0, 0], sizes = [128, 1], strides = [1, 1]} : vector<128x2xf32> to vector<128x1xf32>
    %9 = vector.extract_strided_slice %7 {offsets = [0, 1], sizes = [128, 1], strides = [1, 1]} : vector<128x2xf32> to vector<128x1xf32>
    %10 = arith.maximumf %8, %9 : vector<128x1xf32>
    %11 = arith.subf %8, %10 : vector<128x1xf32>
    %12 = math.exp %11 : vector<128x1xf32>
    %13 = arith.subf %9, %10 : vector<128x1xf32>
    %14 = math.exp %13 : vector<128x1xf32>
    %15 = arith.addf %12, %14 : vector<128x1xf32>
    %16 = tpu.reciprocal %15 {approx = true} : vector<128x1xf32> -> vector<128x1xf32>
    %17 = arith.mulf %12, %16 : vector<128x1xf32>
    %18 = vector.extract_strided_slice %2 {offsets = [0, 0], sizes = [128, 32], strides = [1, 1]} : vector<128x64xf32> to vector<128x32xf32>
    %19 = vector.broadcast %17 : vector<128x1xf32> to vector<128x32xf32>
    %20 = arith.mulf %19, %18 : vector<128x32xf32>
    %21 = arith.mulf %14, %16 : vector<128x1xf32>
    %22 = vector.extract_strided_slice %2 {offsets = [0, 32], sizes = [128, 32], strides = [1, 1]} : vector<128x64xf32> to vector<128x32xf32>
    %23 = vector.broadcast %21 : vector<128x1xf32> to vector<128x32xf32>
    %24 = arith.mulf %23, %22 : vector<128x32xf32>
    %25 = arith.addf %20, %24 : vector<128x32xf32>
    %26 = arith.truncf %25 : vector<128x32xf32> to vector<128x32xbf16>
    %c0_9 = arith.constant 0 : index
    %c0_10 = arith.constant 0 : index
    %27 = vector.load %arg6[%c0_9, %c0_10] : memref<32x256xbf16, #tpu.memory_space<vmem>>, vector<32x256xbf16>
    %cst_11 = arith.constant dense<0.000000e+00> : vector<128x256xf32>
    %28 = tpu.matmul %26, %27, %cst_11 {dimension_numbers = #tpu.dot_dimension_numbers<[1], [0], [0], [1], [0, 0, 1, 1], [], []>} : vector<128x32xbf16>, vector<32x256xbf16>, vector<128x256xf32> -> vector<128x256xf32>
    %c0_12 = arith.constant 0 : index
    %c0_13 = arith.constant 0 : index
    %29 = vector.load %arg3[%c0_12, %c0_13] : memref<128x128xf32, #tpu.memory_space<vmem>>, vector<128x128xf32>
    %30 = vector.extract_strided_slice %28 {offsets = [0, 0], sizes = [128, 128], strides = [1, 1]} : vector<128x256xf32> to vector<128x128xf32>
    %31 = arith.addf %29, %30 : vector<128x128xf32>
    %32 = arith.mulf %31, %31 : vector<128x128xf32>
    %cst_14 = arith.constant dense<0.000000e+00> : vector<128xf32>
    %33 = vector.multi_reduction <add>, %32, %cst_14 [1] : vector<128x128xf32> to vector<128xf32>
    %34 = vector.shape_cast %33 : vector<128xf32> to vector<128x1xf32>
    %cst_15 = arith.constant 1.000000e-24 : f32
    %35 = vector.broadcast %cst_15 : f32 to vector<128x1xf32>
    %36 = arith.maximumf %34, %35 : vector<128x1xf32>
    %37 = math.rsqrt %36 : vector<128x1xf32>
    %38 = vector.broadcast %37 : vector<128x1xf32> to vector<128x128xf32>
    %39 = arith.mulf %31, %38 : vector<128x128xf32>
    %c0_16 = arith.constant 0 : index
    %c0_17 = arith.constant 0 : index
    %40 = vector.load %arg7[%c0_16, %c0_17] : memref<128x256xf32, #tpu.memory_space<vmem>>, vector<128x128xf32>
    tpu.vector_store %arg7[%c0_16, %c0_17], %39 {strides = array<i32>} : memref<128x256xf32, #tpu.memory_space<vmem>>, vector<128x128xf32>,
    %41 = vector.extract_strided_slice %28 {offsets = [0, 128], sizes = [128, 128], strides = [1, 1]} : vector<128x256xf32> to vector<128x128xf32>
    %42 = arith.addf %29, %41 : vector<128x128xf32>
    %43 = arith.mulf %42, %42 : vector<128x128xf32>
    %cst_18 = arith.constant dense<0.000000e+00> : vector<128xf32>
    %44 = vector.multi_reduction <add>, %43, %cst_18 [1] : vector<128x128xf32> to vector<128xf32>
    %45 = vector.shape_cast %44 : vector<128xf32> to vector<128x1xf32>
    %cst_19 = arith.constant 1.000000e-24 : f32
    %46 = vector.broadcast %cst_19 : f32 to vector<128x1xf32>
    %47 = arith.maximumf %45, %46 : vector<128x1xf32>
    %48 = math.rsqrt %47 : vector<128x1xf32>
    %49 = vector.broadcast %48 : vector<128x1xf32> to vector<128x128xf32>
    %50 = arith.mulf %42, %49 : vector<128x128xf32>
    %c0_20 = arith.constant 0 : index
    %c128 = arith.constant 128 : index
    %51 = vector.load %arg7[%c0_20, %c128] : memref<128x256xf32, #tpu.memory_space<vmem>>, vector<128x128xf32>
    tpu.vector_store %arg7[%c0_20, %c128], %50 {strides = array<i32>} : memref<128x256xf32, #tpu.memory_space<vmem>>, vector<128x128xf32>,
    return
  }
  func.func @transform_0(%arg0: i32) -> (i32, i32) {
    %c0_i32 = arith.constant 0 : i32
    %c0_i32_0 = arith.constant 0 : i32
    return %arg0, %c0_i32 : i32, i32
  }
  func.func @transform_1(%arg0: i32) -> (i32, i32) {
    %c0_i32 = arith.constant 0 : i32
    %c0_i32_0 = arith.constant 0 : i32
    %c0_i32_1 = arith.constant 0 : i32
    return %c0_i32, %c0_i32_0 : i32, i32
  }
  func.func @transform_2(%arg0: i32) -> (i32, i32) {
    %c0_i32 = arith.constant 0 : i32
    %c0_i32_0 = arith.constant 0 : i32
    return %arg0, %c0_i32 : i32, i32
  }
  func.func @transform_3(%arg0: i32) -> (i32, i32) {
    %c0_i32 = arith.constant 0 : i32
    %c0_i32_0 = arith.constant 0 : i32
    %c0_i32_1 = arith.constant 0 : i32
    return %c0_i32, %c0_i32_0 : i32, i32
  }
  func.func @transform_4(%arg0: i32) -> (i32, i32) {
    %c0_i32 = arith.constant 0 : i32
    %c0_i32_0 = arith.constant 0 : i32
    %c0_i32_1 = arith.constant 0 : i32
    return %c0_i32, %c0_i32_0 : i32, i32
  }
  func.func @transform_5(%arg0: i32) -> (i32, i32) {
    %c0_i32 = arith.constant 0 : i32
    %c0_i32_0 = arith.constant 0 : i32
    %c0_i32_1 = arith.constant 0 : i32
    return %c0_i32, %c0_i32_0 : i32, i32
  }
  func.func @transform_6(%arg0: i32) -> (i32, i32) {
    %c0_i32 = arith.constant 0 : i32
    %c0_i32_0 = arith.constant 0 : i32
    return %arg0, %c0_i32 : i32, i32
  }
}

</mosaic_0001>

<bundles_post_ra>
// kernel: tpu_custom_call.1
= control target key start
LH: loop header
LB: loop body
LE: loop exit
PB: predicated region body
PF: predicated region fallthrough
CT: control target
= control target key end

     0   :  { %11 = vsyncpa [#allocation3], 0  ;;  %s4017_s0 = inlined_call_operand.vmem [shape: bf16[256,64], index: 0, kind: input, shape index: {}]   ;;  %s4018_s1 = inlined_call_operand.vmem [shape: bf16[64,64], index: 1, kind: input, shape index: {}]   ;;  %s4019_s2 = inlined_call_operand.vmem [shape: f32[256,128], index: 2, kind: input, shape index: {}]   ;;  %s4020_s3 = inlined_call_operand.vmem [shape: f32[64,32], index: 3, kind: input, shape index: {}]   ;;  %s4021_s4 = inlined_call_operand.vmem [shape: f32[32,2], index: 4, kind: input, shape index: {}]   ;;  %s4022_s5 = inlined_call_operand.vmem [shape: bf16[32,256], index: 5, kind: input, shape index: {}]   ;;  %s4023_s6 = inlined_call_operand.hbm [shape: f32[256,256], index: 6, kind: output, shape index: {}]  }
   0x1   :  { %13 = vsyncpa [#allocation3 + $0x1], 0  ;;  %s2731_s21 = smov 0   ;;  %s2733_s22 = smov 0  }
   0x2   :  { %s2735_s23 = smov 0   ;;  %s2737_s24 = smov 0  }
   0x3 LB: > { %s2752_s25 = sadd.s32 4294967295, %s2687_s24   ;;  %s2202_s26 = sadd.s32 4294967294, %s2687_s24   ;;  %s2687_s24 = sphi %s2737_s24, %s4052_s24   ;;  %s2683_s23 = sphi %s2735_s23, %s4051_s23   ;;  %s2679_s22 = sphi %s2733_s22, %s4050_s22   ;;  %s2675_s21 = sphi %s2731_s21, %s4049_s21  }
   0x4   : > { %s2756_s27 = sadd.s32 1, %s2687_s24   ;;  %s162_s28 = sadd.s32 1, %s2683_s23 }
   0x5   : > { %s159_s29 = ssub.s32 %s2687_s24, %s2756_s27  ;;  %p172_p0 = scmp.ne.s32.totalorder %s2683_s23, %s2679_s22 }
   0x6   : > { %p160_p1 = scmp.eq.s32.totalorder %s159_s29, 0  ;;  %p173_p2 = scmp.eq.s32.totalorder %s2752_s25, 1 }
   0x7   : > { %p178_p3 = scmp.ne.s32.totalorder %s2679_s22, %s2675_s21  ;;  %p179_p4 = scmp.eq.s32.totalorder %s2202_s26, 1 }
   0x8   : > { %s2767_s30 = scalar_select %p160_p1, %s2683_s23, %s162_s28  }
   0x9   : > { %p2769_p5 = por %p173_p2, %p172_p0  ;;  %p2773_p6 = por %p179_p4, %p178_p3 }
   0xa   : > { %p2205_p7 = scmp.ge.s32.totalorder %s2687_s24, 1  ;;  %p227_p8 = scmp.lt.s32.totalorder %s2687_s24, 3 }
   0xc   : > { %p228_p9 = pnand %p2205_p7, %p227_p8 }
   0xe   : > { %231 = sbr.rel (%p228_p9) target bundleno = 1955 (0x7a3), region = 44 }
  0x13   : > { %v2348_v0 = vld [vmem:[%s4018_s1 + $0x18] sm:$0xff]  ;;  %s2207_s11 = sshll.u32 %s2752_s25, 4  ;;  %v2347_v1 = vld [vmem:[%s4018_s1 + $0x10] sm:$0xff]  ;;  %v2346_v2 = vld [vmem:[%s4018_s1 + $0x8] sm:$0xff]  ;;  %vm364_vm0 = vcmask 523264   ;;  %vm579_vm1 = vcmask 261120  }
  0x14   : > { %p263_p10 = scmp.lt.s32.totalorder %s2207_s11, 31  ;;  %393 = vmatpush.bf16.msra.mxu0 %v2348_v0  ;;  %v2345_v3 = vld [vmem:[%s4018_s1] sm:$0xff]  ;;  %v445_v9 = vld [vmem:[%s4020_s3 + $0x38] sm:$0xff]  ;;  %v444_v10 = vld [vmem:[%s4020_s3 + $0x30] sm:$0xff]  ;;  %s2689_s18 = smov 127  }
  0x15   : > { %502 = vmatpush.msra.mxu1 %v445_v9  ;;  %v443_v11 = vld [vmem:[%s4020_s3 + $0x28] sm:$0xff]  ;;  %v442_v13 = vld [vmem:[%s4020_s3 + $0x20] sm:$0xff]  ;;  %v441_v14 = vld [vmem:[%s4020_s3 + $0x18] sm:$0xff]  ;;  %s2690_s19 = smov 1   ;;  %s2693_s20 = smov 96  }
  0x16   : > { %s4054_s11 = smov (!%p263_p10, %s2207_s11), 31  ;;  %v440_v15 = vld [vmem:[%s4020_s3 + $0x10] sm:$0xff]  ;;  %v439_v16 = vld [vmem:[%s4020_s3 + $0x8] sm:$0xff]  ;;  %v438_v18 = vld [vmem:[%s4020_s3] sm:$0xff]  ;;  %s2354_s15 = sshll.u32 %s2752_s25, 8 }
  0x17   : > { %s2208_s16 = sshll.u32 %s4054_s11, 2  ;;  %503 = vmatpush.msra.mxu1 %v444_v10  ;;  %v578_v32 = vld [vmem:[%s4021_s4 + $0x18] sm:$0xff]  ;;  %v577_v33 = vld [vmem:[%s4021_s4 + $0x10] sm:$0xff]  ;;  %v576_v35 = vld [vmem:[%s4021_s4 + $0x8] sm:$0xff]  ;;  %s2645_s10 = scalar_lea.hbm %s4023_s6, 512 }
  0x18   : > { %394 = vmatpush.bf16.msra.mxu0 %v2347_v1  ;;  %s2798_s26 = scalar_lea.vmem %s4017_s0, %s2208_s16  ;;  %2355 = vmatpush.msra.mxu2 %v578_v32  ;;  %v575_v36 = vld [vmem:[%s4021_s4] sm:$0xff] }
  0x19   : > { %v2337_v4 = vld [vmem:[%s2798_s26] sm:$0xff]  ;;  %v2338_v5 = vld [vmem:[%s2798_s26 + $0x8] sm:$0xff]  ;;  %v2339_v6 = vld [vmem:[%s2798_s26 + $0x10] sm:$0xff]  ;;  %504 = vmatpush.msra.mxu1 %v443_v11 }
  0x1a   : > { %v2340_v7 = vld [vmem:[%s2798_s26 + $0x18] sm:$0xff]  ;;  %v2341_v8 = vld [vmem:[%s2798_s26 + $0x20] sm:$0xff]  ;;  %v2342_v12 = vld [vmem:[%s2798_s26 + $0x28] sm:$0xff]  ;;  %2356 = vmatpush.msra.mxu2 %v577_v33 }
  0x1b   : > { %505 = vmatpush.msra.mxu1 %v442_v13  ;;  %v2343_v17 = vld [vmem:[%s2798_s26 + $0x30] sm:$0xff]  ;;  %v2344_v19 = vld [vmem:[%s2798_s26 + $0x38] sm:$0xff] }
  0x1c   : > { %395 = vmatpush.bf16.msra.mxu0 %v2346_v2  ;;  %2357 = vmatpush.msra.mxu2 %v576_v35 }
  0x1d   : > { %506 = vmatpush.msra.mxu1 %v441_v14 }
  0x1e   : > { %2358 = vmatpush.msra.mxu2 %v575_v36 }
  0x1f   : > { %507 = vmatpush.msra.mxu1 %v440_v15 }
  0x20   : > { %396 = vmatpush.bf16.msra.mxu0 %v2345_v3 }
  0x21   : > { %508 = vmatpush.msra.mxu1 %v439_v16 }
  0x23   : > { %2259 = vmatmul.msk.bf16.vlgmr.msra.gmra.mxu0 %vm364_vm0, %v2337_v4  ;;  %509 = vmatpush.msra.mxu1 %v438_v18 }
  0x25   : > { %640 = vmatpush.msrb.mxu1 %v578_v32 }
  0x27   : > { %641 = vmatpush.msrb.mxu1 %v577_v33 }
  0x29   : > { %642 = vmatpush.msrb.mxu1 %v576_v35 }
  0x2b   : > { %643 = vmatpush.msrb.mxu1 %v575_v36 }
  0x33   : > { %2260 = vmatmul.msk.bf16.gmra.mxu0 %vm364_vm0, %v2338_v5 }
  0x43   : > { %2261 = vmatmul.msk.bf16.gmra.mxu0 %vm364_vm0, %v2339_v6 }
  0x53   : > { %2262 = vmatmul.msk.bf16.gmra.mxu0 %vm364_vm0, %v2340_v7 }
  0x63   : > { %2263 = vmatmul.msk.bf16.gmra.mxu0 %vm364_vm0, %v2341_v8 }
  0x73   : > { %2264 = vmatmul.msk.bf16.gmra.mxu0 %vm364_vm0, %v2342_v12 }
  0x83   : > { %2265 = vmatmul.msk.bf16.gmra.mxu0 %vm364_vm0, %v2343_v17 }
  0x93   : > { %2266 = vmatmul.msk.bf16.gmra.mxu0 %vm364_vm0, %v2344_v19 }
  0xa0   : > { %v2840_v20 = vpop.f32.mrf.mxu0 }
  0xa1   : > { %4038 = vst [vmem:[#allocation5_spill] sm:$0xff] %v2840_v20  ;;  %2267 = vmatmul.msk.f32.vlgmr.msra.gmra.mxu1 %vm364_vm0, %v2840_v20 }
  0xa8   : > { %v2844_v21 = vpop.f32.mrf.mxu0 }
  0xa9   : > { %4039 = vst [vmem:[#allocation6_spill] sm:$0xff] %v2844_v21  ;;  %2268 = vmatmul.msk.f32.gmra.mxu1 %vm364_vm0, %v2844_v21 }
  0xb0   : > { %v2848_v22 = vpop.f32.mrf.mxu0 }
  0xb1   : > { %4040 = vst [vmem:[#allocation7_spill] sm:$0xff] %v2848_v22  ;;  %2269 = vmatmul.msk.f32.gmra.mxu1 %vm364_vm0, %v2848_v22 }
  0xb8   : > { %v2852_v23 = vpop.f32.mrf.mxu0 }
  0xb9   : > { %4041 = vst [vmem:[#allocation8_spill] sm:$0xff] %v2852_v23  ;;  %2270 = vmatmul.msk.f32.gmra.mxu1 %vm364_vm0, %v2852_v23 }
  0xc0   : > { %v2856_v24 = vpop.f32.mrf.mxu0 }
  0xc1   : > { %2271 = vmatmul.msk.f32.gmra.mxu1 %vm364_vm0, %v2856_v24 }
  0xc8   : > { %v2860_v25 = vpop.f32.mrf.mxu0 }
  0xc9   : > { %2272 = vmatmul.msk.f32.gmra.mxu1 %vm364_vm0, %v2860_v25 }
  0xd0   : > { %v2864_v26 = vpop.f32.mrf.mxu0 }
  0xd1   : > { %2273 = vmatmul.msk.f32.gmra.mxu1 %vm364_vm0, %v2864_v26 }
  0xd8   : > { %v2868_v27 = vpop.f32.mrf.mxu0 }
  0xd9   : > { %2274 = vmatmul.msk.f32.gmra.mxu1 %vm364_vm0, %v2868_v27 }
  0xe0   : > { %v2872_v28 = vpop.f32.mrf.mxu0 }
  0xe1   : > { %2275 = vmatmul.msk.f32.gmra.mxu1 %vm364_vm0, %v2872_v28 }
  0xe8   : > { %v2876_v29 = vpop.f32.mrf.mxu0 }
  0xe9   : > { %2276 = vmatmul.msk.f32.gmra.mxu1 %vm364_vm0, %v2876_v29 }
  0xf0   : > { %v2880_v30 = vpop.f32.mrf.mxu0 }
  0xf1   : > { %2277 = vmatmul.msk.f32.gmra.mxu1 %vm364_vm0, %v2880_v30 }
  0xf8   : > { %v2884_v31 = vpop.f32.mrf.mxu0 }
  0xf9   : > { %2278 = vmatmul.msk.f32.gmra.mxu1 %vm364_vm0, %v2884_v31 }
 0x100   : > { %v2894_v34 = vpop.f32.mrf.mxu0 }
 0x101   : > { %2279 = vmatmul.msk.f32.gmra.mxu1 %vm364_vm0, %v2894_v34 }
 0x108   : > { %v2904_v37 = vpop.f32.mrf.mxu0 }
 0x109   : > { %2280 = vmatmul.msk.f32.gmra.mxu1 %vm364_vm0, %v2904_v37 }
 0x110   : > { %v2908_v38 = vpop.f32.mrf.mxu0 }
 0x111   : > { %4042 = vst [vmem:[#allocation9_spill] sm:$0xff] %v2908_v38  ;;  %2281 = vmatmul.msk.f32.gmra.mxu1 %vm364_vm0, %v2908_v38 }
 0x118   : > { %v2912_v39 = vpop.f32.mrf.mxu0 }
 0x119   : > { %2282 = vmatmul.msk.f32.gmra.mxu1 %vm364_vm0, %v2912_v39 }
 0x11e   : > { %v511_v40 = vpop.f32.mrf.mxu1 }
 0x11f   : > { %2433 = vtanh.f32 %v511_v40 }
 0x125   : > { %v2434_v41 = vpop.eup %2433 }
 0x126   : > { %v514_v42 = vpop.f32.mrf.mxu1  ;;  %2283 = vmatmul.msk.f32.vlgmr.msrb.gmra.mxu1 %vm579_vm1, %v2434_v41 }
 0x127   : > { %2435 = vtanh.f32 %v514_v42 }
 0x12d   : > { %v2436_v43 = vpop.eup %2435 }
 0x12e   : > { %v517_v44 = vpop.f32.mrf.mxu1  ;;  %2284 = vmatmul.msk.f32.vlgmr.msra.gmra.mxu2 %vm579_vm1, %v2436_v43 }
 0x12f   : > { %2437 = vtanh.f32 %v517_v44 }
 0x135   : > { %v2438_v45 = vpop.eup %2437 }
 0x136   : > { %v520_v46 = vpop.f32.mrf.mxu1  ;;  %2285 = vmatmul.msk.f32.gmra.mxu2 %vm579_vm1, %v2438_v45 }
 0x137   : > { %2439 = vtanh.f32 %v520_v46 }
 0x13d   : > { %v2440_v47 = vpop.eup %2439 }
 0x13e   : > { %v523_v48 = vpop.f32.mrf.mxu1  ;;  %2286 = vmatmul.msk.f32.gmra.mxu2 %vm579_vm1, %v2440_v47 }
 0x13f   : > { %2441 = vtanh.f32 %v523_v48 }
 0x145   : > { %v2442_v49 = vpop.eup %2441 }
 0x146   : > { %v526_v50 = vpop.f32.mrf.mxu1  ;;  %2287 = vmatmul.msk.f32.gmra.mxu2 %vm579_vm1, %v2442_v49 }
 0x147   : > { %2443 = vtanh.f32 %v526_v50 }
 0x14d   : > { %v2444_v51 = vpop.eup %2443 }
 0x14e   : > { %v529_v52 = vpop.f32.mrf.mxu1  ;;  %2288 = vmatmul.msk.f32.gmra.mxu2 %vm579_vm1, %v2444_v51 }
 0x14f   : > { %2445 = vtanh.f32 %v529_v52 }
 0x155   : > { %v2446_v53 = vpop.eup %2445 }
 0x156   : > { %v532_v54 = vpop.f32.mrf.mxu1  ;;  %2289 = vmatmul.msk.f32.gmra.mxu2 %vm579_vm1, %v2446_v53 }
 0x157   : > { %2447 = vtanh.f32 %v532_v54 }
 0x15d   : > { %v2448_v55 = vpop.eup %2447 }
 0x15e   : > { %v535_v56 = vpop.f32.mrf.mxu1  ;;  %2290 = vmatmul.msk.f32.gmra.mxu2 %vm579_vm1, %v2448_v55 }
 0x15f   : > { %2449 = vtanh.f32 %v535_v56 }
 0x165   : > { %v2450_v57 = vpop.eup %2449 }
 0x166   : > { %v538_v58 = vpop.f32.mrf.mxu1  ;;  %2291 = vmatmul.msk.f32.gmra.mxu2 %vm579_vm1, %v2450_v57 }
 0x167   : > { %2451 = vtanh.f32 %v538_v58 }
 0x16d   : > { %v2452_v59 = vpop.eup %2451 }
 0x16e   : > { %v541_v60 = vpop.f32.mrf.mxu1  ;;  %2292 = vmatmul.msk.f32.gmra.mxu2 %vm579_vm1, %v2452_v59 }
 0x16f   : > { %2453 = vtanh.f32 %v541_v60 }
 0x175   : > { %v2454_v61 = vpop.eup %2453 }
 0x176   : > { %2293 = vmatmul.msk.f32.gmra.mxu2 %vm579_vm1, %v2454_v61  ;;  %v544_v62 = vpop.f32.mrf.mxu1 }
 0x177   : > { %2455 = vtanh.f32 %v544_v62 }
 0x17d   : > { %v2456_v63 = vpop.eup %2455 }
 0x17e   : > { %v547_v0 = vpop.f32.mrf.mxu1  ;;  %2294 = vmatmul.msk.f32.gmra.mxu2 %vm579_vm1, %v2456_v63 }
 0x17f   : > { %2457 = vtanh.f32 %v547_v0 }
 0x185   : > { %v2458_v1 = vpop.eup %2457 }
 0x186   : > { %v550_v2 = vpop.f32.mrf.mxu1  ;;  %2295 = vmatmul.msk.f32.gmra.mxu2 %vm579_vm1, %v2458_v1 }
 0x187   : > { %2459 = vtanh.f32 %v550_v2 }
 0x18d   : > { %v2460_v3 = vpop.eup %2459 }
 0x18e   : > { %v553_v4 = vpop.f32.mrf.mxu1  ;;  %2296 = vmatmul.msk.f32.gmra.mxu2 %vm579_vm1, %v2460_v3 }
 0x18f   : > { %2461 = vtanh.f32 %v553_v4 }
 0x195   : > { %v2462_v5 = vpop.eup %2461 }
 0x196   : > { %v556_v6 = vpop.f32.mrf.mxu1  ;;  %2297 = vmatmul.msk.f32.gmra.mxu2 %vm579_vm1, %v2462_v5 }
 0x197   : > { %2463 = vtanh.f32 %v556_v6 }
 0x19d   : > { %v2464_v7 = vpop.eup %2463 }
 0x19e   : > { %2298 = vmatmul.msk.f32.gmra.mxu2 %vm579_vm1, %v2464_v7 }
 0x1a3   : > { %v3035_v1 = vpop.f32.mrf.mxu1 }
 0x1b1   : > { %v2932_v8 = vpop.f32.mrf.mxu2 }
 0x1b9   : > { %v2934_v9 = vpop.f32.mrf.mxu2 }
 0x1c1   : > { %v2936_v10 = vpop.f32.mrf.mxu2 }
 0x1c9   : > { %v2938_v11 = vpop.f32.mrf.mxu2 }
 0x1ca   : > { %717 = vrot.lane.b32.xlu0 %v2938_v11, %s2689_s18 }
 0x1d1   : > { %v2942_v12 = vpop.f32.mrf.mxu2 }
 0x1d2   : > { %719 = vrot.lane.b32.xlu0 %v2942_v12, %s2689_s18 }
 0x1d9   : > { %v2946_v13 = vpop.f32.mrf.mxu2 }
 0x1da   : > { %721 = vrot.lane.b32.xlu1 %v2946_v13, %s2689_s18 }
 0x1e1   : > { %v2950_v14 = vpop.f32.mrf.mxu2 }
 0x1e2   : > { %723 = vrot.lane.b32.xlu1 %v2950_v14, %s2689_s18 }
 0x1e9   : > { %v2954_v15 = vpop.f32.mrf.mxu2 }
 0x1ea   : > { %725 = vrot.lane.b32.xlu2 %v2954_v15, %s2689_s18 }
 0x1f1   : > { %v2958_v16 = vpop.f32.mrf.mxu2 }
 0x1f2   : > { %727 = vrot.lane.b32.xlu2 %v2958_v16, %s2689_s18 }
 0x1f9   : > { %v2962_v17 = vpop.f32.mrf.mxu2 }
 0x1fa   : > { %729 = vrot.lane.b32.xlu2 %v2962_v17, %s2689_s18 }
 0x201   : > { %v2966_v18 = vpop.f32.mrf.mxu2 }
 0x209   : > { %v2973_v33 = vpop.f32.mrf.mxu2 }
 0x211   : > { %v2982_v41 = vpop.f32.mrf.mxu2 }
 0x219   : > { %v2991_v45 = vpop.f32.mrf.mxu2 }
 0x221   : > { %v3008_v51 = vpop.f32.mrf.mxu2 }
 0x23c   : > { %v718_v19 = vpop.permute.xlu0 %717 }
 0x23d   : > { %v2969_v32 = vmax.f32 %v2938_v11, %v718_v19 }
 0x23f   : > { %845 = vrot.lane.b32.xlu0 %v2969_v32, %s2690_s19 }
 0x244   : > { %v720_v35 = vpop.permute.xlu0 %719  ;;  %v726_v40 = vpop.permute.xlu2 %725 }
 0x245   : > { %v2976_v36 = vmax.f32 %v2942_v12, %v720_v35  ;;  %v3017_v52 = vmax.f32 %v2954_v15, %v726_v40 }
 0x247   : > { %847 = vrot.lane.b32.xlu1 %v2976_v36, %s2690_s19  ;;  %731 = vrot.lane.b32.xlu0 %v2966_v18, %s2689_s18 }
 0x24c   : > { %v722_v42 = vpop.permute.xlu1 %721  ;;  %v728_v44 = vpop.permute.xlu2 %727 }
 0x24d   : > { %v2985_v43 = vmax.f32 %v2946_v13, %v722_v42  ;;  %v2994_v47 = vmax.f32 %v2958_v16, %v728_v44 }
 0x24f   : > { %849 = vrot.lane.b32.xlu1 %v2985_v43, %s2690_s19  ;;  %733 = vrot.lane.b32.xlu0 %v2973_v33, %s2689_s18 }
 0x254   : > { %v724_v46 = vpop.permute.xlu1 %723  ;;  %v730_v49 = vpop.permute.xlu2 %729 }
 0x255   : > { %v2997_v48 = vmax.f32 %v2950_v14, %v724_v46  ;;  %v3006_v50 = vmax.f32 %v2962_v17, %v730_v49 }
 0x257   : > { %851 = vrot.lane.b32.xlu2 %v2997_v48, %s2690_s19  ;;  %855 = vrot.lane.b32.xlu0 %v2994_v47, %s2690_s19 }
 0x258   : > { %735 = vrot.lane.b32.xlu1 %v2982_v41, %s2689_s18 }
 0x25f   : > { %857 = vrot.lane.b32.xlu0 %v3006_v50, %s2690_s19  ;;  %739 = vrot.lane.b32.xlu2 %v3008_v51, %s2689_s18 }
 0x260   : > { %737 = vrot.lane.b32.xlu1 %v2991_v45, %s2689_s18 }
 0x267   : > { %853 = vrot.lane.b32.xlu2 %v3017_v52, %s2690_s19 }
 0x2b1   : > { %v846_v53 = vpop.permute.xlu0 %845  ;;  %v852_v54 = vpop.permute.xlu2 %851 }
 0x2b2   : > { %v889_v2 = vsub.f32 %v2938_v11, %v846_v53  ;;  %v892_v7 = vsub.f32 %v2950_v14, %v852_v54 }
 0x2b4   : > { %v909_v3 = vmul.f32 1.442695, %v889_v2  ;;  %v915_v35 = vmul.f32 1.442695, %v892_v7 }
 0x2b9   : > { %v848_v55 = vpop.permute.xlu1 %847  ;;  %v732_v56 = vpop.permute.xlu0 %731 }
 0x2ba   : > { %v3022_v57 = vmax.f32 %v2966_v18, %v732_v56  ;;  %v740_v58 = vpop.permute.xlu2 %739  ;;  %v890_v60 = vsub.f32 %v2942_v12, %v848_v55 }
 0x2bb   : > { %v3025_v59 = vmax.f32 %v3008_v51, %v740_v58 }
 0x2bc   : > { %859 = vrot.lane.b32.xlu1 %v3022_v57, %s2690_s19  ;;  %v911_v63 = vmul.f32 1.442695, %v890_v60 }
 0x2bd   : > { %867 = vrot.lane.b32.xlu0 %v3025_v59, %s2690_s19 }
 0x2be   : > { %2465 = vpow2.f32 %v911_v63 }
 0x2bf   : > { %2467 = vpow2.f32 %v909_v3 }
 0x2c0   : > { %2469 = vpow2.f32 %v915_v35  ;;  %v778_v35 = vsub.f32 %v2942_v12, %v2976_v36 }
 0x2c1   : > { %v850_v61 = vpop.permute.xlu1 %849  ;;  %v734_v62 = vpop.permute.xlu0 %733 }
 0x2c2   : > { %v3033_v0 = vmax.f32 %v2973_v33, %v734_v62  ;;  %v891_v19 = vsub.f32 %v2946_v13, %v850_v61  ;;  %v854_v2 = vpop.permute.xlu2 %853 }
 0x2c3   : > { %v893_v22 = vsub.f32 %v2954_v15, %v854_v2 }
 0x2c4   : > { %861 = vrot.lane.b32.xlu1 %v3033_v0, %s2690_s19  ;;  %v3045_v6 = vpop.eup %2465  ;;  %v913_v42 = vmul.f32 1.442695, %v891_v19 }
 0x2c5   : > { %709 = vrot.lane.b32.xlu0 %v3035_v1, %s2689_s18  ;;  %v3055_v44 = vpop.eup %2467 }
 0x2c6   : > { %2471 = vpow2.f32 %v913_v42  ;;  %v3064_v54 = vpop.eup %2469  ;;  %v4028_v42 = vmov 0  }
 0x2c7   : > { %2409 = vset.pattern.permute.xlu0 %v4028_v42 }
 0x2c9   : > { %v856_v40 = vpop.permute.xlu0 %855 }
 0x2ca   : > { %v736_v4 = vpop.permute.xlu1 %735  ;;  %v894_v46 = vsub.f32 %v2958_v16, %v856_v40 }
 0x2cb   : > { %v3043_v5 = vmax.f32 %v2982_v41, %v736_v4 }
 0x2cc   : > { %711 = vrot.lane.b32.xlu1 %v2932_v8, %s2689_s18  ;;  %v919_v53 = vmul.f32 1.442695, %v894_v46  ;;  %v3069_v58 = vpop.eup %2471  ;;  %v799_v46 = vmul.f32 1.442695, %v778_v35 }
 0x2cd   : > { %863 = vrot.lane.b32.xlu2 %v3043_v5, %s2690_s19  ;;  %959 = vrot.lane.b32.xlu0 %v3045_v6, %s2689_s18 }
 0x2ce   : > { %2473 = vpow2.f32 %v919_v53 }
 0x2d1   : > { %v858_v55 = vpop.permute.xlu0 %857 }
 0x2d2   : > { %v738_v49 = vpop.permute.xlu1 %737  ;;  %v895_v60 = vsub.f32 %v2962_v17, %v858_v55  ;;  %v777_v55 = vsub.f32 %v2938_v11, %v2969_v32  ;;  %v917_v32 = vmul.f32 1.442695, %v893_v22 }
 0x2d3   : > { %v3067_v56 = vmax.f32 %v2991_v45, %v738_v49 }
 0x2d4   : > { %715 = vrot.lane.b32.xlu1 %v2936_v10, %s2689_s18  ;;  %v921_v61 = vmul.f32 1.442695, %v895_v60  ;;  %v3078_v62 = vpop.eup %2473  ;;  %v797_v35 = vmul.f32 1.442695, %v777_v55 }
 0x2d5   : > { %957 = vrot.lane.b32.xlu2 %v3055_v44, %s2689_s18  ;;  %713 = vrot.lane.b32.xlu0 %v2934_v9, %s2689_s18 }
 0x2d6   : > { %2475 = vpow2.f32 %v921_v61 }
 0x2d7   : > { %2477 = vpow2.f32 %v799_v46 }
 0x2dc   : > { %963 = vrot.lane.b32.xlu1 %v3064_v54, %s2689_s18  ;;  %v3082_v63 = vpop.eup %2475 }
 0x2dd   : > { %865 = vrot.lane.b32.xlu2 %v3067_v56, %s2690_s19  ;;  %961 = vrot.lane.b32.xlu0 %v3069_v58, %s2689_s18  ;;  %v2478_v2 = vpop.eup %2477 }
 0x2e5   : > { %967 = vrot.lane.b32.xlu2 %v3078_v62, %s2689_s18 }
 0x2ed   : > { %969 = vrot.lane.b32.xlu2 %v3082_v63, %s2689_s18 }
 0x327   : > { %v864_v3 = vpop.permute.xlu2 %863 }
 0x328   : > { %v898_v36 = vsub.f32 %v2982_v41, %v864_v3 }
 0x32e   : > { %v860_v4 = vpop.permute.xlu1 %859 }
 0x32f   : > { %v868_v7 = vpop.permute.xlu0 %867  ;;  %v958_v19 = vpop.permute.xlu2 %957  ;;  %v896_v40 = vsub.f32 %v2966_v18, %v860_v4 }
 0x330   : > { %v900_v22 = vsub.f32 %v3008_v51, %v868_v7 }
 0x331   : > { %v923_v49 = vmul.f32 1.442695, %v896_v40  ;;  %v927_v40 = vmul.f32 1.442695, %v898_v36 }
 0x333   : > { %2479 = vpow2.f32 %v923_v49  ;;  %v780_v49 = vsub.f32 %v2950_v14, %v2997_v48 }
 0x336   : > { %v862_v53 = vpop.permute.xlu1 %861 }
 0x337   : > { %v897_v60 = vsub.f32 %v2973_v33, %v862_v53  ;;  %v710_v61 = vpop.permute.xlu0 %709  ;;  %v866_v12 = vpop.permute.xlu2 %865 }
 0x338   : > { %v3095_v21 = vmax.f32 %v3035_v1, %v710_v61  ;;  %v899_v11 = vsub.f32 %v2991_v45, %v866_v12  ;;  %v803_v12 = vmul.f32 1.442695, %v780_v49 }
 0x339   : > { %v925_v4 = vmul.f32 1.442695, %v897_v60  ;;  %v3104_v3 = vpop.eup %2479 }
 0x33a   : > { %837 = vrot.lane.b32.xlu0 %v3095_v21, %s2690_s19  ;;  %v929_v61 = vmul.f32 1.442695, %v899_v11  ;;  %v931_v11 = vmul.f32 1.442695, %v900_v22 }
 0x33b   : > { %2481 = vpow2.f32 %v925_v4 }
 0x33c   : > { %2483 = vpow2.f32 %v797_v35 }
 0x33d   : > { %2485 = vpow2.f32 %v917_v32 }
 0x33e   : > { %v712_v53 = vpop.permute.xlu1 %711  ;;  %2487 = vpow2.f32 %v927_v40 }
 0x33f   : > { %v3102_v42 = vmax.f32 %v2932_v8, %v712_v53  ;;  %v960_v46 = vpop.permute.xlu0 %959 }
 0x340   : > { %v1002_v55 = vadd.f32 %v2478_v2, %v960_v46 }
 0x341   : > { %v3108_v60 = vpop.eup %2481  ;;  %839 = vrot.lane.b32.xlu1 %v3102_v42, %s2690_s19 }
 0x342   : > { %2489 = vrcp.f32 %v1002_v55  ;;  %971 = vrot.lane.b32.xlu0 %v3104_v3, %s2689_s18  ;;  %973 = vrot.lane.b32.xlu2 %v3108_v60, %s2689_s18  ;;  %v2484_v14 = vpop.eup %2483 }
 0x343   : > { %2491 = vpow2.f32 %v929_v61  ;;  %v3117_v48 = vpop.eup %2485  ;;  %v1001_v36 = vadd.f32 %v2484_v14, %v958_v19 }
 0x344   : > { %v3119_v35 = vpop.eup %2487  ;;  %2493 = vpow2.f32 %v803_v12 }
 0x345   : > { %2495 = vrcp.f32 %v1001_v36 }
 0x346   : > { %v716_v4 = vpop.permute.xlu1 %715  ;;  %2497 = vpow2.f32 %v931_v11 }
 0x347   : > { %v3138_v22 = vmax.f32 %v2936_v10, %v716_v4  ;;  %v785_v4 = vsub.f32 %v2973_v33, %v3033_v0  ;;  %v779_v33 = vsub.f32 %v2946_v13, %v2985_v43  ;;  %v782_v13 = vsub.f32 %v2958_v16, %v2994_v47 }
 0x348   : > { %v2490_v32 = vpop.eup %2489  ;;  %v2692_v43 = vmov 1  }
 0x349   : > { %v3121_v40 = vpop.eup %2491  ;;  %965 = vrot.lane.b32.xlu1 %v3117_v48, %s2689_s18  ;;  %v3125_v53 = vmul.f32 %v2490_v32, %v2478_v2  ;;  %v714_v2 = vpop.permute.xlu0 %713  ;;  %2414 = vset.pattern.permute.xlu2 %v2692_v43 }
 0x34a   : > { %975 = vrot.lane.b32.xlu0 %v3119_v35, %s2689_s18  ;;  %977 = vrot.lane.b32.xlu2 %v3121_v40, %s2689_s18  ;;  %v2494_v7 = vpop.eup %2493  ;;  %v3141_v12 = vmax.f32 %v2934_v9, %v714_v2 }
 0x34b   : > { %v2496_v46 = vpop.eup %2495  ;;  %2411 = vset.pattern.permute.xlu1 %v2692_v43 }
 0x34c   : > { %v3131_v49 = vpop.eup %2497  ;;  %v1033_v36 = vmul.f32 %v2496_v46, %v2484_v14  ;;  %v787_v14 = vsub.f32 %v2991_v45, %v3067_v56  ;;  %v801_v56 = vmul.f32 1.442695, %v779_v33 }
 0x34e   : > { %v964_v19 = vpop.permute.xlu1 %963 }
 0x34f   : > { %v1004_v61 = vadd.f32 %v2494_v7, %v964_v19  ;;  %v813_v19 = vmul.f32 1.442695, %v785_v4  ;;  %v784_v4 = vsub.f32 %v2966_v18, %v3022_v57  ;;  %v786_v18 = vsub.f32 %v2982_v41, %v3043_v5 }
 0x351   : > { %2499 = vrcp.f32 %v1004_v61  ;;  %1165 = vrot.lane.b32.xlu1 %v2496_v46, %s2690_s19  ;;  %v815_v16 = vmul.f32 1.442695, %v786_v18 }
 0x352   : > { %979 = vrot.lane.b32.xlu0 %v3131_v49, %s2689_s18  ;;  %1167 = vrot.lane.b32.xlu2 %v2490_v32, %s2690_s19  ;;  %v3150_v32 = vpop.permute.xlu2 %967  ;;  %2501 = vpow2.f32 %v813_v19  ;;  %v811_v19 = vmul.f32 1.442695, %v784_v4 }
 0x357   : > { %v2500_v55 = vpop.eup %2499 }
 0x358   : > { %v3143_v11 = vmul.f32 %v2500_v55, %v2494_v7  ;;  %v817_v7 = vmul.f32 1.442695, %v787_v14  ;;  %v2502_v46 = vpop.eup %2501  ;;  %v781_v14 = vsub.f32 %v2954_v15, %v3017_v52 }
 0x359   : > { %843 = vrot.lane.b32.xlu1 %v3138_v22, %s2690_s19 }
 0x35a   : > { %1067 = vperm.xlu0 %2409, %v1033_v36   ;;  %841 = vrot.lane.b32.xlu2 %v3141_v12, %s2690_s19  ;;  %v3154_v61 = vpop.permute.xlu2 %969  ;;  %2503 = vpow2.f32 %v817_v7  ;;  %v805_v57 = vmul.f32 1.442695, %v781_v14 }
 0x360   : > { %v2504_v23 = vpop.eup %2503 }
 0x362   : > { %1171 = vrot.lane.b32.xlu2 %v2500_v55, %s2690_s19  ;;  %v962_v55 = vpop.permute.xlu0 %961  ;;  %2410 = vset.pattern.permute.xlu0 %v2692_v43 }
 0x39c   : > { %v974_v2 = vpop.permute.xlu2 %973 }
 0x39d   : > { %v1009_v36 = vadd.f32 %v2502_v46, %v974_v2 }
 0x39f   : > { %2505 = vrcp.f32 %v1009_v36 }
 0x3a4   : > { %v978_v20 = vpop.permute.xlu2 %977 }
 0x3a5   : > { %v3158_v38 = vpop.eup %2505  ;;  %v1011_v0 = vadd.f32 %v2504_v23, %v978_v20 }
 0x3a6   : > { %v3165_v45 = vmul.f32 %v3158_v38, %v2502_v46  ;;  %v807_v46 = vmul.f32 1.442695, %v782_v13 }
 0x3a7   : > { %2507 = vrcp.f32 %v1011_v0 }
 0x3a8   : > { %2509 = vpow2.f32 %v801_v56 }
 0x3a9   : > { %2511 = vpow2.f32 %v811_v19 }
 0x3ac   : > { %v838_v7 = vpop.permute.xlu0 %837  ;;  %v1168_v13 = vpop.permute.xlu2 %1167 }
 0x3ad   : > { %v3169_v2 = vpop.eup %2507  ;;  %v885_v20 = vsub.f32 %v3035_v1, %v838_v7 }
 0x3ae   : > { %v3179_v15 = vmul.f32 %v3169_v2, %v2504_v23  ;;  %v3182_v47 = vpop.eup %2509  ;;  %v783_v23 = vsub.f32 %v2962_v17, %v3006_v50 }
 0x3af   : > { %v901_v52 = vmul.f32 1.442695, %v885_v20  ;;  %v2512_v33 = vpop.eup %2511  ;;  %v1003_v0 = vadd.f32 %v3182_v47, %v962_v55 }
 0x3b0   : > { %v809_v14 = vmul.f32 1.442695, %v783_v23 }
 0x3b1   : > { %2513 = vpow2.f32 %v901_v52 }
 0x3b2   : > { %2515 = vpow2.f32 %v805_v57 }
 0x3b3   : > { %v840_v36 = vpop.permute.xlu1 %839  ;;  %2517 = vpow2.f32 %v807_v46 }
 0x3b4   : > { %v886_v41 = vsub.f32 %v2932_v8, %v840_v36  ;;  %v972_v5 = vpop.permute.xlu0 %971  ;;  %2519 = vpow2.f32 %v815_v16 }
 0x3b5   : > { %v1008_v4 = vadd.f32 %v2512_v33, %v972_v5 }
 0x3b6   : > { %v903_v56 = vmul.f32 1.442695, %v886_v41 }
 0x3b7   : > { %v3188_v19 = vpop.eup %2513  ;;  %2521 = vrcp.f32 %v1008_v4 }
 0x3b8   : > { %2523 = vpow2.f32 %v903_v56  ;;  %949 = vrot.lane.b32.xlu1 %v3188_v19, %s2689_s18  ;;  %v2516_v7 = vpop.eup %2515 }
 0x3b9   : > { %2525 = vrcp.f32 %v1003_v0  ;;  %v3192_v20 = vpop.eup %2517  ;;  %v842_v0 = vpop.permute.xlu2 %841 }
 0x3ba   : > { %v2520_v17 = vpop.eup %2519  ;;  %v1006_v50 = vadd.f32 %v3192_v20, %v3150_v32  ;;  %2527 = vpow2.f32 %v809_v14 }
 0x3bb   : > { %v966_v18 = vpop.permute.xlu1 %965 }
 0x3bc   : > { %v1005_v55 = vadd.f32 %v2516_v7, %v966_v18  ;;  %v976_v52 = vpop.permute.xlu0 %975  ;;  %v887_v18 = vsub.f32 %v2934_v9, %v842_v0 }
 0x3bd   : > { %v2522_v57 = vpop.eup %2521  ;;  %v1010_v46 = vadd.f32 %v2520_v17, %v976_v52 }
 0x3be   : > { %v3196_v16 = vpop.eup %2523  ;;  %2529 = vrcp.f32 %v1005_v55  ;;  %1179 = vrot.lane.b32.xlu0 %v2522_v57, %s2690_s19  ;;  %v3199_v36 = vmul.f32 %v2522_v57, %v2512_v33  ;;  %v4043_v57 = vmov 0  }
 0x3bf   : > { %v2526_v41 = vpop.eup %2525  ;;  %2531 = vrcp.f32 %v1010_v46  ;;  %951 = vrot.lane.b32.xlu2 %v3196_v16, %s2689_s18 }
 0x3c0   : > { %2533 = vrcp.f32 %v1006_v50  ;;  %1169 = vrot.lane.b32.xlu1 %v2526_v41, %s2690_s19  ;;  %v3204_v32 = vpop.eup %2527  ;;  %v905_v50 = vmul.f32 1.442695, %v887_v18  ;;  %v1035_v46 = vmul.f32 %v2526_v41, %v3182_v47 }
 0x3c1   : > { %v1007_v23 = vadd.f32 %v3204_v32, %v3154_v61 }
 0x3c3   : > { %2535 = vrcp.f32 %v1007_v23  ;;  %v1166_v61 = vpop.permute.xlu1 %1165 }
 0x3c4   : > { %v2530_v5 = vpop.eup %2529  ;;  %2537 = vpow2.f32 %v905_v50  ;;  %v980_v23 = vpop.permute.xlu0 %979 }
 0x3c5   : > { %v2532_v4 = vpop.eup %2531  ;;  %v3208_v56 = vmul.f32 %v2530_v5, %v2516_v7  ;;  %v1209_v7 = vmul.f32 %v3055_v44, %v1166_v61  ;;  %v1172_v44 = vpop.permute.xlu2 %1171 }
 0x3c6   : > { %v3210_v33 = vpop.eup %2533  ;;  %1181 = vrot.lane.b32.xlu0 %v3158_v38, %s2690_s19  ;;  %v3214_v14 = vmul.f32 %v2532_v4, %v2520_v17  ;;  %v1210_v17 = vmul.f32 %v3045_v6, %v1168_v13  ;;  %v1212_v52 = vmul.f32 %v3064_v54, %v1172_v44  ;;  %v774_v6 = vsub.f32 %v2932_v8, %v3102_v42 }
 0x3c7   : > { %1175 = vrot.lane.b32.xlu2 %v3210_v33, %s2690_s19  ;;  %v788_v8 = vsub.f32 %v3008_v51, %v3025_v59 }
 0x3c8   : > { %1173 = vrot.lane.b32.xlu1 %v2530_v5, %s2690_s19 }
 0x3c9   : > { %v3221_v55 = vpop.eup %2535  ;;  %v819_v42 = vmul.f32 1.442695, %v788_v8 }
 0x3ca   : > { %v3226_v38 = vpop.eup %2537 }
 0x3cb   : > { %v844_v0 = vpop.permute.xlu1 %843 }
 0x3ce   : > { %1243 = vperm.xlu0 %2410, %v1209_v7  }
 0x3cf   : > { %1177 = vrot.lane.b32.xlu2 %v3221_v55, %s2690_s19 }
 0x3d0   : > { %1183 = vrot.lane.b32.xlu1 %v2532_v4, %s2690_s19 }
 0x3d6   : > { %953 = vrot.lane.b32.xlu0 %v3226_v38, %s2689_s18 }
 0x3d7   : > { %1185 = vrot.lane.b32.xlu2 %v3169_v2, %s2690_s19  ;;  %v791_v2 = vmul.f32 1.442695, %v774_v6 }
 0x3d8   : > { %1248 = vperm.xlu1 %2411, %v1210_v17   ;;  %v888_v17 = vsub.f32 %v2936_v10, %v844_v0 }
 0x3d9   : > { %2539 = vpow2.f32 %v791_v2 }
 0x3da   : > { %v907_v44 = vmul.f32 1.442695, %v888_v17  ;;  %v2352_v17 = vld [vmem:[%s4022_s5 + $0x14] sm:$0xf0] }
 0x3df   : > { %1258 = vperm.xlu2 %2414, %v1212_v52   ;;  %v3242_v54 = vpop.eup %2539 }
 0x3e0   : > { %2412 = vset.pattern.permute.xlu1 %v4043_v57 }
 0x3e1   : > { %1072 = vperm.xlu1 %2412, %v3125_v53   ;;  %v773_v53 = vsub.f32 %v3035_v1, %v3095_v21  ;;  %v3257_v21 = vpop.permute.xlu0 %1067 }
 0x3e3   : > { %v789_v47 = vmul.f32 1.442695, %v773_v53 }
 0x3e5   : > { %2541 = vpow2.f32 %v789_v47 }
 0x3e6   : > { %2543 = vpow2.f32 %v819_v42 }
 0x3e7   : > { %2415 = vset.pattern.permute.xlu2 %v4043_v57 }
 0x3e8   : > { %1077 = vperm.xlu2 %2415, %v1035_v46  }
 0x3e9   : > { %2413 = vset.pattern.permute.xlu1 %v2692_v43 }
 0x3eb   : > { %v3252_v18 = vpop.eup %2541 }
 0x3ec   : > { %v3261_v1 = vpop.eup %2543 }
 0x3ed   : > { %v1012_v51 = vadd.f32 %v3261_v1, %v980_v23 }
 0x3ef   : > { %2545 = vrcp.f32 %v1012_v51 }
 0x3f0   : > { %2416 = vset.pattern.permute.xlu2 %v2692_v43  ;;  %2547 = vpow2.f32 %v907_v44 }
 0x3f5   : > { %v3268_v6 = vpop.eup %2545 }
 0x419   : > { %v952_v13 = vpop.permute.xlu2 %951 }
 0x41a   : > { %v3245_v5 = vadd.f32 %v3242_v54, %v952_v13  ;;  %v3273_v13 = vpop.eup %2547 }
 0x421   : > { %v1176_v41 = vpop.permute.xlu2 %1175 }
 0x422   : > { %v1214_v4 = vmul.f32 %v3078_v62, %v1176_v41 }
 0x424   : > { %1268 = vperm.xlu0 %2410, %v1214_v4  }
 0x429   : > { %v1178_v53 = vpop.permute.xlu2 %1177 }
 0x42a   : > { %v950_v61 = vpop.permute.xlu1 %949  ;;  %v1215_v0 = vmul.f32 %v3082_v63, %v1178_v53 }
 0x42b   : > { %v3255_v50 = vadd.f32 %v3252_v18, %v950_v61 }
 0x42c   : > { %2417 = vset.pattern.permute.xlu0 %v4043_v57 }
 0x42d   : > { %1082 = vperm.xlu0 %2417, %v3143_v11  }
 0x430   : > { %v1180_v7 = vpop.permute.xlu0 %1179 }
 0x431   : > { %v1216_v2 = vmul.f32 %v3104_v3, %v1180_v7  ;;  %v1186_v3 = vpop.permute.xlu2 %1185  ;;  %v2309_v7 = vld [vmem:[%s4022_s5 + $0x10] sm:$0xf] }
 0x432   : > { %v1170_v59 = vpop.permute.xlu1 %1169  ;;  %v2310_v44 = vor.u32 %v2352_v17, %v2309_v7 }
 0x433   : > { %v1211_v62 = vmul.f32 %v3069_v58, %v1170_v59 }
 0x434   : > { %2359 = vmatpush.bf16.msra.mxu3 %v2310_v44  ;;  %1459 = vmatpush.bf16.msrb.mxu0 %v2310_v44  ;;  %v1044_v44 = vmul.f32 %v3268_v6, %v3261_v1 }
 0x435   : > { %1253 = vperm.xlu1 %2413, %v1211_v62   ;;  %2418 = vset.pattern.permute.xlu0 %v2692_v43 }
 0x438   : > { %v1182_v11 = vpop.permute.xlu0 %1181 }
 0x439   : > { %v1217_v4 = vmul.f32 %v3108_v60, %v1182_v11  ;;  %v1259_v42 = vpop.permute.xlu2 %1258 }
 0x43a   : > { %v1174_v52 = vpop.permute.xlu1 %1173  ;;  %v1308_v63 = vmul.f32 %v1259_v42, %v2868_v27 }
 0x43b   : > { %v1213_v46 = vmul.f32 %v3117_v48, %v1174_v52 }
 0x43d   : > { %1187 = vrot.lane.b32.xlu1 %v3268_v6, %s2690_s19  ;;  %1263 = vperm.xlu2 %2416, %v1213_v46   ;;  %v2350_v46 = vld [vmem:[%s4022_s5 + $0x4] sm:$0xf0] }
 0x440   : > { %v1244_v47 = vpop.permute.xlu0 %1243 }
 0x441   : > { %v1305_v41 = vmul.f32 %v1244_v47, %v2856_v24 }
 0x442   : > { %v1184_v58 = vpop.permute.xlu1 %1183  ;;  %v3291_v51 = vpop.permute.xlu2 %1077 }
 0x443   : > { %v1218_v8 = vmul.f32 %v3119_v35, %v1184_v58  ;;  %v775_v35 = vsub.f32 %v2934_v9, %v3141_v12  ;;  %v1039_v9 = vmul.f32 %v3221_v55, %v3204_v32  ;;  %v2301_v12 = vld [vmem:[%s4022_s5] sm:$0xf]  ;;  %v1131_v1 = vmul.f32 %v3291_v51, %v2864_v26 }
 0x444   : > { %v2302_v11 = vor.u32 %v2350_v46, %v2301_v12 }
 0x445   : > { %955 = vrot.lane.b32.xlu1 %v3273_v13, %s2689_s18  ;;  %1278 = vperm.xlu2 %2416, %v1216_v2   ;;  %v793_v62 = vmul.f32 1.442695, %v775_v35  ;;  %s2124_s18 = scalar_lea.hbm %s4023_s6, %s2354_s15 }
 0x446   : > { %2360 = vmatpush.bf16.msra.mxu3 %v2302_v11  ;;  %1460 = vmatpush.bf16.msrb.mxu0 %v2302_v11 }
 0x447   : > { %2549 = vpow2.f32 %v793_v62 }
 0x448   : > { %v954_v61 = vpop.permute.xlu0 %953 }
 0x44a   : > { %v1249_v48 = vpop.permute.xlu1 %1248 }
 0x44b   : > { %v1306_v23 = vmul.f32 %v1249_v48, %v2860_v25  ;;  %v776_v48 = vsub.f32 %v2936_v10, %v3138_v22 }
 0x44d   : > { %1341 = vrot.lane.b32.xlu2 %v1305_v41, %s2693_s20  ;;  %1343 = vrot.lane.b32.xlu0 %v1306_v23, %s2693_s20  ;;  %v3311_v2 = vpop.eup %2549  ;;  %v795_v41 = vmul.f32 1.442695, %v776_v48 }
 0x44e   : > { %1273 = vperm.xlu1 %2413, %v1215_v0   ;;  %2419 = vset.pattern.permute.xlu2 %v4043_v57  ;;  %v999_v53 = vadd.f32 %v3311_v2, %v954_v61 }
 0x450   : > { %2551 = vrcp.f32 %v999_v53 }
 0x451   : > { %2553 = vpow2.f32 %v795_v41 }
 0x453   : > { %v1073_v52 = vpop.permute.xlu1 %1072 }
 0x455   : > { %1087 = vperm.xlu2 %2419, %v3208_v56   ;;  %1283 = vperm.xlu0 %2418, %v1217_v4  }
 0x456   : > { %1288 = vperm.xlu1 %2413, %v1218_v8   ;;  %v3321_v0 = vpop.eup %2551  ;;  %v1038_v8 = vmul.f32 %v3210_v33, %v3192_v20  ;;  %v1129_v20 = vmul.f32 %v3257_v21, %v2856_v24  ;;  %v1130_v33 = vmul.f32 %v1073_v52, %v2860_v25 }
 0x457   : > { %v2554_v10 = vpop.eup %2553 }
 0x45d   : > { %1347 = vrot.lane.b32.xlu2 %v1308_v63, %s2693_s20  ;;  %2423 = vset.pattern.permute.xlu0 %v4043_v57 }
 0x45e   : > { %2422 = vset.pattern.permute.xlu2 %v2692_v43  ;;  %2420 = vset.pattern.permute.xlu1 %v4043_v57 }
 0x496   : > { %v1269_v60 = vpop.permute.xlu0 %1268 }
 0x497   : > { %v1310_v56 = vmul.f32 %v1269_v60, %v2876_v29  ;;  %v1264_v59 = vpop.permute.xlu2 %1263  ;;  %v1219_v60 = vmul.f32 %v3121_v40, %v1186_v3 }
 0x498   : > { %v1309_v63 = vmul.f32 %v1264_v59, %v2872_v28 }
 0x499   : > { %1351 = vrot.lane.b32.xlu0 %v1310_v56, %s2693_s20 }
 0x49f   : > { %v1279_v58 = vpop.permute.xlu2 %1278  ;;  %v1083_v22 = vpop.permute.xlu0 %1082 }
 0x4a0   : > { %v1312_v47 = vmul.f32 %v1279_v58, %v2884_v31  ;;  %v1132_v6 = vmul.f32 %v1083_v22, %v2868_v27  ;;  %v4044_v22 = vld [vmem:[#allocation9_spill] sm:$0xff] }
 0x4a1   : > { %1097 = vperm.xlu0 %2423, %v1039_v9  }
 0x4a7   : > { %v1254_v32 = vpop.permute.xlu1 %1253 }
 0x4a8   : > { %v1307_v55 = vmul.f32 %v1254_v32, %v2864_v26 }
 0x4a9   : > { %1355 = vrot.lane.b32.xlu0 %v1312_v47, %s2693_s20 }
 0x4aa   : > { %1345 = vrot.lane.b32.xlu1 %v1307_v55, %s2693_s20  ;;  %2427 = vset.pattern.permute.xlu0 %v2692_v43 }
 0x4af   : > { %v1188_v23 = vpop.permute.xlu1 %1187 }
 0x4b0   : > { %v1220_v4 = vmul.f32 %v3131_v49, %v1188_v23  ;;  %v1342_v49 = vpop.permute.xlu2 %1341 }
 0x4b1   : > { %1161 = vrot.lane.b32.xlu0 %v3321_v0, %s2690_s19  ;;  %v1385_v59 = vadd.f32 %v1342_v49, %v1129_v20 }
 0x4b2   : > { %1092 = vperm.xlu1 %2420, %v1038_v8   ;;  %1298 = vperm.xlu2 %2422, %v1220_v4  }
 0x4b7   : > { %v956_v42 = vpop.permute.xlu1 %955 }
 0x4b8   : > { %v1000_v61 = vadd.f32 %v2554_v10, %v956_v42 }
 0x4ba   : > { %2555 = vrcp.f32 %v1000_v61  ;;  %2421 = vset.pattern.permute.xlu1 %v2692_v43  ;;  %1349 = vrot.lane.b32.xlu2 %v1309_v63, %s2693_s20 }
 0x4bb   : > { %2557 = vrcp.f32 %v3255_v50  ;;  %1293 = vperm.xlu1 %2421, %v1219_v60   ;;  %2425 = vset.pattern.permute.xlu2 %v4043_v57 }
 0x4bc   : > { %2559 = vrcp.f32 %v3245_v5 }
 0x4bf   : > { %v1344_v35 = vpop.permute.xlu0 %1343 }
 0x4c0   : > { %v2556_v56 = vpop.eup %2555  ;;  %v1386_v40 = vadd.f32 %v1344_v35, %v1130_v33  ;;  %v1274_v3 = vpop.permute.xlu1 %1273 }
 0x4c1   : > { %v2558_v62 = vpop.eup %2557  ;;  %v3337_v7 = vmul.f32 %v2556_v56, %v2554_v10  ;;  %v1311_v24 = vmul.f32 %v1274_v3, %v2880_v30 }
 0x4c2   : > { %v3339_v17 = vpack.c.bf16 %v1386_v40, %v1385_v59  ;;  %1157 = vrot.lane.b32.xlu2 %v2558_v62, %s2690_s19  ;;  %v3350_v21 = vpop.eup %2559 }
 0x4c3   : > { %2424 = vset.pattern.permute.xlu1 %v4043_v57 }
 0x4c4   : > { %1102 = vperm.xlu1 %2424, %v3199_v36   ;;  %2317 = vmatmul.msk.bf16.vlgmr.msra.gmra.mxu3 %vm579_vm1, %v3339_v17 }
 0x4c7   : > { %v1284_v36 = vpop.permute.xlu0 %1283 }
 0x4c8   : > { %v1289_v25 = vpop.permute.xlu1 %1288  ;;  %v1313_v5 = vmul.f32 %v1284_v36, %v2894_v34 }
 0x4c9   : > { %v1314_v50 = vmul.f32 %v1289_v25, %v2904_v37 }
 0x4ca   : > { %1353 = vrot.lane.b32.xlu2 %v1311_v24, %s2693_s20 }
 0x4cb   : > { %1359 = vrot.lane.b32.xlu0 %v1314_v50, %s2693_s20  ;;  %v1030_v50 = vmul.f32 %v3350_v21, %v3242_v54  ;;  %v2351_v54 = vld [vmem:[%s4022_s5 + $0x14] sm:$0xf] }
 0x4cc   : > { %1159 = vrot.lane.b32.xlu1 %v3350_v21, %s2690_s19 }
 0x4d2   : > { %1112 = vperm.xlu2 %2425, %v3214_v14   ;;  %v1088_v14 = vpop.permute.xlu2 %1087 }
 0x4d3   : > { %v1133_v27 = vmul.f32 %v1088_v14, %v2872_v28 }
 0x4d4   : > { %1107 = vperm.xlu1 %2424, %v3165_v45  }
 0x4da   : > { %1357 = vrot.lane.b32.xlu2 %v1313_v5, %s2693_s20  ;;  %v1348_v52 = vpop.permute.xlu2 %1347  ;;  %v4045_v5 = vld [vmem:[#allocation5_spill] sm:$0xff] }
 0x4db   : > { %v1388_v47 = vadd.f32 %v1348_v52, %v1132_v6 }
 0x4dc   : > { %1163 = vrot.lane.b32.xlu1 %v2556_v56, %s2690_s19  ;;  %s2127_s19 = sshll.u32 %s2124_s18, 4  ;;  %s2128_s19 = int_to_ptr.hbm [resolvable:$true] %s2127_s19 }
 0x4dd   : > { %s2639_s29 = sshra.s32 %s2128_s19, 4  ;;  %s2640_s29 = int_to_ptr.hbm [resolvable:$true] %s2639_s29 }
 0x4de   : > { %s2641_s9 = scalar_lea.hbm %s2640_s29, 256  ;;  %p2646_p0 = scmp.lt.s32.totalorder %s2640_s29, %s4023_s6 }
 0x4df   : > { %p2642_p11 = scmp.ne.s32.totalorder %s2640_s29, %s2641_s9  ;;  %p2647_p1 = scmp.lt.s32.totalorder %s2645_s10, %s2641_s9 }
 0x4e1   : > { %p2643_p12 = pnand %p2642_p11, %p2769_p5  ;;  %p2648_p2 = por %p2647_p1, %p2646_p0 }
 0x4e2   : > { %1122 = vperm.xlu2 %2425, %v1044_v44  }
 0x4e3   : > { %p2644_p13 = pneg %p2643_p12 }
 0x4e4   : > { %1117 = vperm.xlu1 %2424, %v3179_v15  }
 0x4e5   : > { %p2649_p3 = pnand %p2648_p2, %p2644_p13 }
 0x4ea   : > { %2426 = vset.pattern.permute.xlu2 %v2692_v43 }
 0x4ec   : > { %2428 = vset.pattern.permute.xlu1 %v2692_v43 }
 0x50b   : > { %v1352_v45 = vpop.permute.xlu0 %1351 }
 0x50c   : > { %v1299_v9 = vpop.permute.xlu2 %1298 }
 0x50d   : > { %v1316_v12 = vmul.f32 %v1299_v9, %v2912_v39 }
 0x50f   : > { %1363 = vrot.lane.b32.xlu1 %v1316_v12, %s2693_s20 }
 0x513   : > { %v1098_v46 = vpop.permute.xlu0 %1097 }
 0x514   : > { %v1350_v11 = vpop.permute.xlu2 %1349  ;;  %v1135_v61 = vmul.f32 %v1098_v46, %v2880_v30 }
 0x515   : > { %v1389_v8 = vadd.f32 %v1350_v11, %v1133_v27 }
 0x51b   : > { %v1356_v15 = vpop.permute.xlu0 %1355 }
 0x51c   : > { %v1346_v58 = vpop.permute.xlu1 %1345  ;;  %v1158_v53 = vpop.permute.xlu2 %1157 }
 0x51d   : > { %v1387_v32 = vadd.f32 %v1346_v58, %v1131_v1  ;;  %v1205_v55 = vmul.f32 %v3188_v19, %v1158_v53  ;;  %v1029_v19 = vmul.f32 %v2558_v62, %v3252_v18  ;;  %v4046_v1 = vld [vmem:[#allocation8_spill] sm:$0xff]  ;;  %v4047_v58 = vld [vmem:[#allocation6_spill] sm:$0xff] }
 0x51f   : > { %v3371_v48 = vpack.c.bf16 %v1388_v47, %v1387_v32  ;;  %1223 = vperm.xlu2 %2426, %v1205_v55   ;;  %v4048_v47 = vld [vmem:[#allocation7_spill] sm:$0xff] }
 0x521   : > { %2318 = vmatmul.msk.bf16.gmra.mxu3 %vm579_vm1, %v3371_v48 }
 0x523   : > { %v1162_v41 = vpop.permute.xlu0 %1161 }
 0x524   : > { %v1093_v23 = vpop.permute.xlu1 %1092  ;;  %v1207_v4 = vmul.f32 %v3226_v38, %v1162_v41 }
 0x525   : > { %v1134_v26 = vmul.f32 %v1093_v23, %v2876_v29  ;;  %v1354_v29 = vpop.permute.xlu2 %1353 }
 0x526   : > { %1233 = vperm.xlu1 %2428, %v1207_v4   ;;  %v1391_v18 = vadd.f32 %v1354_v29, %v1135_v61 }
 0x527   : > { %v1390_v51 = vadd.f32 %v1352_v45, %v1134_v26 }
 0x529   : > { %v3381_v63 = vpack.c.bf16 %v1390_v51, %v1389_v8 }
 0x52d   : > { %v1294_v10 = vpop.permute.xlu1 %1293  ;;  %v1113_v35 = vpop.permute.xlu2 %1112 }
 0x52e   : > { %v1315_v42 = vmul.f32 %v1294_v10, %v4044_v22  ;;  %2429 = vset.pattern.permute.xlu1 %v4043_v57 }
 0x52f   : > { %1047 = vperm.xlu1 %2429, %v1029_v19  }
 0x530   : > { %1361 = vrot.lane.b32.xlu0 %v1315_v42, %s2693_s20 }
 0x531   : > { %2319 = vmatmul.msk.bf16.gmra.mxu3 %vm579_vm1, %v3381_v63 }
 0x535   : > { %v1358_v40 = vpop.permute.xlu2 %1357 }
 0x536   : > { %v1103_v38 = vpop.permute.xlu1 %1102 }
 0x537   : > { %v1136_v28 = vmul.f32 %v1103_v38, %v2884_v31  ;;  %v1138_v31 = vmul.f32 %v1113_v35, %v2904_v37 }
 0x539   : > { %v1392_v60 = vadd.f32 %v1356_v15, %v1136_v28 }
 0x53b   : > { %v1402_v33 = vpack.c.bf16 %v1392_v60, %v1391_v18 }
 0x53d   : > { %v1360_v3 = vpop.permute.xlu0 %1359  ;;  %v1123_v37 = vpop.permute.xlu2 %1122 }
 0x53e   : > { %v1160_v49 = vpop.permute.xlu1 %1159  ;;  %v1394_v62 = vadd.f32 %v1360_v3, %v1138_v31  ;;  %v1140_v14 = vmul.f32 %v1123_v37, %v2912_v39 }
 0x53f   : > { %v1206_v20 = vmul.f32 %v3196_v16, %v1160_v49 }
 0x541   : > { %1228 = vperm.xlu0 %2427, %v1206_v20   ;;  %2320 = vmatmul.msk.bf16.gmra.mxu3 %vm579_vm1, %v1402_v33 }
 0x546   : > { %v1108_v56 = vpop.permute.xlu1 %1107 }
 0x547   : > { %v1137_v59 = vmul.f32 %v1108_v56, %v2894_v34  ;;  %v1031_v34 = vmul.f32 %v3321_v0, %v3311_v2  ;;  %v2349_v2 = vld [vmem:[%s4022_s5 + $0x4] sm:$0xf]  ;;  %v2303_v0 = vld [vmem:[%s4022_s5 + $0x8] sm:$0xf0] }
 0x549   : > { %2431 = vset.pattern.permute.xlu0 %v4043_v57  ;;  %v1393_v30 = vadd.f32 %v1358_v40, %v1137_v59 }
 0x54b   : > { %v1403_v16 = vpack.c.bf16 %v1394_v62, %v1393_v30 }
 0x54e   : > { %v1164_v24 = vpop.permute.xlu1 %1163 }
 0x54f   : > { %v1208_v25 = vmul.f32 %v3273_v13, %v1164_v24 }
 0x551   : > { %1238 = vperm.xlu2 %2426, %v1208_v25   ;;  %2321 = vmatmul.msk.bf16.gmra.mxu3 %vm579_vm1, %v1403_v16 }
 0x559   : > { %2430 = vset.pattern.permute.xlu2 %v4043_v57  ;;  %v2311_v57 = vld [vmem:[%s4022_s5 + $0x18] sm:$0xf0] }
 0x55a   : > { %1052 = vperm.xlu2 %2430, %v1030_v50   ;;  %v2314_v13 = vor.u32 %v2351_v54, %v2311_v57 }
 0x55c   : > { %2361 = vmatpush.bf16.msrb.mxu3 %v2314_v13  ;;  %1508 = vmatpush.bf16.msrb.mxu2 %v2314_v13 }
 0x562   : > { %1057 = vperm.xlu2 %2430, %v1031_v34  }
 0x579   : > { %v1224_v36 = vpop.permute.xlu2 %1223 }
 0x57a   : > { %v1301_v44 = vmul.f32 %v1224_v36, %v4045_v5 }
 0x57c   : > { %1333 = vrot.lane.b32.xlu0 %v1301_v44, %s2693_s20 }
 0x584   : > { %1062 = vperm.xlu0 %2431, %v3337_v7   ;;  %v1118_v7 = vpop.permute.xlu1 %1117 }
 0x585   : > { %v1139_v52 = vmul.f32 %v1118_v7, %v4044_v22 }
 0x58c   : > { %2432 = vset.pattern.permute.xlu0 %v2692_v43  ;;  %v2306_v43 = vor.u32 %v2349_v2, %v2303_v0  ;;  %v1364_v21 = vpop.permute.xlu1 %1363 }
 0x58d   : > { %v1396_v9 = vadd.f32 %v1364_v21, %v1140_v14 }
 0x58e   : > { %2362 = vmatpush.bf16.msrb.mxu3 %v2306_v43  ;;  %1509 = vmatpush.bf16.msrb.mxu2 %v2306_v43 }
 0x598   : > { %v1234_v39 = vpop.permute.xlu1 %1233 }
 0x599   : > { %v1303_v32 = vmul.f32 %v1234_v39, %v4048_v47 }
 0x5a1   : > { %v1048_v55 = vpop.permute.xlu1 %1047 }
 0x5a2   : > { %v1362_v45 = vpop.permute.xlu0 %1361  ;;  %v1125_v4 = vmul.f32 %v1048_v55, %v4045_v5 }
 0x5a3   : > { %v1395_v12 = vadd.f32 %v1362_v45, %v1139_v52 }
 0x5a5   : > { %v1404_v46 = vpack.c.bf16 %v1396_v9, %v1395_v12 }
 0x5a7   : > { %2322 = vmatmul.msk.bf16.gmra.mxu3 %vm579_vm1, %v1404_v46 }
 0x5ab   : > { %v1239_v11 = vpop.permute.xlu2 %1238 }
 0x5ac   : > { %v1304_v6 = vmul.f32 %v1239_v11, %v4046_v1 }
 0x5ae   : > { %1339 = vrot.lane.b32.xlu2 %v1304_v6, %s2693_s20 }
 0x5b3   : > { %v1229_v15 = vpop.permute.xlu0 %1228 }
 0x5b4   : > { %v1302_v53 = vmul.f32 %v1229_v15, %v4047_v58  ;;  %v1053_v41 = vpop.permute.xlu2 %1052 }
 0x5b6   : > { %1335 = vrot.lane.b32.xlu1 %v1302_v53, %s2693_s20 }
 0x5b7   : > { %2326 = vmatmul.msk.bf16.vlgmr.msrb.gmra.mxu3 %vm579_vm1, %v3371_v48  ;;  %v1126_v48 = vmul.f32 %v1053_v41, %v4047_v58 }
 0x5bc   : > { %v1058_v10 = vpop.permute.xlu2 %1057 }
 0x5bd   : > { %v1127_v42 = vmul.f32 %v1058_v10, %v4048_v47 }
 0x5be   : > { %1337 = vrot.lane.b32.xlu1 %v1303_v32, %s2693_s20  ;;  %s2210_s20 = sshll.u32 %s4054_s11, 3  ;;  %s259_s11 = sand.u32 1, %s2679_s22  }
 0x5bf   : > { %s3468_s12 = scalar_lea.vmem %s4019_s2, %s2210_s20  ;;  %s2206_s13 = sshll.u32 %s259_s11, 8 }
 0x5c0   : > { %v1552_v34 = vld [vmem:[%s3468_s12 + $0x8] sm:$0xff]  ;;  %v1553_v2 = vld [vmem:[%s3468_s12 + $0x10] sm:$0xff]  ;;  %v1554_v9 = vld [vmem:[%s3468_s12 + $0x18] sm:$0xff]  ;;  %s3647_s14 = scalar_lea.vmem [#allocation2], %s2206_s13  ;;  %s2112_s28 = scalar_lea.sflag [#allocation3], %s259_s11 }
 0x5c1   : > { %v1555_v47 = vld [vmem:[%s3468_s12 + $0x20] sm:$0xff]  ;;  %s2125_s25 = sshll.u32 %s3647_s14, 4  ;;  %s2126_s25 = int_to_ptr.vmem [resolvable:$true] %s2125_s25 }
 0x5c7   : > { %2327 = vmatmul.msk.bf16.gmra.mxu3 %vm579_vm1, %v3381_v63  ;;  %v3437_v63 = vpop.f32.mrf.mxu3 }
 0x5c8   : > { %v3516_v32 = vadd.f32 %v1555_v47, %v3437_v63  ;;  %v1557_v63 = vld [vmem:[%s3468_s12 + $0x30] sm:$0xff] }
 0x5cf   : > { %v3442_v18 = vpop.f32.mrf.mxu3 }
 0x5d7   : > { %2328 = vmatmul.msk.bf16.gmra.mxu3 %vm579_vm1, %v1402_v33  ;;  %v3444_v49 = vpop.f32.mrf.mxu3 }
 0x5df   : > { %v1479_v20 = vpop.f32.mrf.mxu3 }
 0x5e7   : > { %2329 = vmatmul.msk.bf16.gmra.mxu3 %vm579_vm1, %v1403_v16  ;;  %v3448_v33 = vpop.f32.mrf.mxu3 }
 0x5ee   : > { %v1334_v23 = vpop.permute.xlu0 %1333 }
 0x5ef   : > { %v1381_v27 = vadd.f32 %v1334_v23, %v1125_v4  ;;  %v3450_v35 = vpop.f32.mrf.mxu3  ;;  %v1587_v4 = vmul.f32 %v3516_v32, %v3516_v32 }
 0x5f6   : > { %v1063_v19 = vpop.permute.xlu0 %1062 }
 0x5f7   : > { %2330 = vmatmul.msk.bf16.gmra.mxu3 %vm579_vm1, %v1404_v46  ;;  %v1128_v38 = vmul.f32 %v1063_v19, %v4046_v1  ;;  %v3452_v56 = vpop.f32.mrf.mxu3 }
 0x5ff   : > { %v3454_v59 = vpop.f32.mrf.mxu3 }
 0x607   : > { %v3456_v40 = vpop.f32.mrf.mxu3 }
 0x608   : > { %v1340_v29 = vpop.permute.xlu2 %1339 }
 0x609   : > { %v1384_v61 = vadd.f32 %v1340_v29, %v1128_v38  ;;  %v1561_v29 = vld [vmem:[%s3468_s12 + $0x50] sm:$0xff] }
 0x60f   : > { %v3458_v3 = vpop.f32.mrf.mxu3 }
 0x628   : > { %v1336_v26 = vpop.permute.xlu1 %1335 }
 0x629   : > { %v1382_v51 = vadd.f32 %v1336_v26, %v1126_v48  ;;  %v1558_v26 = vld [vmem:[%s3468_s12 + $0x38] sm:$0xff] }
 0x62a   : > { %v3460_v31 = vpop.f32.mrf.mxu3 }
 0x62b   : > { %v1397_v8 = vpack.c.bf16 %v1382_v51, %v1381_v27  ;;  %v1556_v27 = vld [vmem:[%s3468_s12 + $0x28] sm:$0xff]  ;;  %v3528_v51 = vadd.f32 %v1558_v26, %v1479_v20 }
 0x62d   : > { %2315 = vmatmul.msk.bf16.vlgmr.msrb.gmra.mxu0 %vm579_vm1, %v1397_v8  ;;  %2323 = vmatmul.msk.bf16.vlgmr.msrb.gmra.mxu2 %vm579_vm1, %v1397_v8  ;;  %v3531_v8 = vadd.f32 %v1556_v27, %v3442_v18  ;;  %v3548_v18 = vadd.f32 %v1561_v29, %v3452_v56 }
 0x630   : > { %v1338_v22 = vpop.permute.xlu1 %1337 }
 0x631   : > { %v1383_v28 = vadd.f32 %v1338_v22, %v1127_v42  ;;  %v1590_v22 = vmul.f32 %v3528_v51, %v3528_v51 }
 0x632   : > { %v3462_v30 = vpop.f32.mrf.mxu3 }
 0x633   : > { %v1398_v60 = vpack.c.bf16 %v1384_v61, %v1383_v28  ;;  %v1588_v28 = vmul.f32 %v3531_v8, %v3531_v8  ;;  %v1559_v61 = vld [vmem:[%s3468_s12 + $0x40] sm:$0xff] }
 0x634   : > { %v3551_v20 = vadd.f32 %v1559_v61, %v3448_v33 }
 0x63a   : > { %v3471_v62 = vpop.f32.mrf.mxu3 }
 0x63d   : > { %2316 = vmatmul.msk.bf16.gmra.mxu0 %vm579_vm1, %v1398_v60  ;;  %2324 = vmatmul.msk.bf16.gmra.mxu2 %vm579_vm1, %v1398_v60  ;;  %v3545_v60 = vadd.f32 %v1557_v63, %v3444_v49  ;;  %v1591_v49 = vmul.f32 %v3551_v20, %v3551_v20 }
 0x642   : > { %v3482_v44 = vpop.f32.mrf.mxu3 }
 0x64a   : > { %v3497_v52 = vpop.f32.mrf.mxu3 }
 0x64d   : > { %2325 = vmatmul.msk.bf16.gmra.mxu2 %vm579_vm1, %v3339_v17  ;;  %v1551_v17 = vld [vmem:[%s3468_s12] sm:$0xff] }
 0x652   : > { %v3508_v15 = vpop.f32.mrf.mxu3 }
 0x65a   : > { %v3520_v23 = vpop.f32.mrf.mxu3 }
 0x662   : > { %v1538_v38 = vpop.f32.mrf.mxu3 }
 0x66a   : > { %v1541_v56 = vpop.f32.mrf.mxu3 }
 0x6aa   : > { %v1462_v24 = vpop.f32.mrf.mxu0 }
 0x6ab   : > { %v3473_v25 = vadd.f32 %v1551_v17, %v1462_v24  ;;  %v1589_v24 = vmul.f32 %v3545_v60, %v3545_v60 }
 0x6ad   : > { %v1583_v16 = vmul.f32 %v3473_v25, %v3473_v25 }
 0x6af   : > { %1599 = vadd.xlane.f32.xlu1 %v1583_v16  ;;  %v1560_v16 = vld [vmem:[%s3468_s12 + $0x48] sm:$0xff] }
 0x6b0   : > { %v1511_v50 = vpop.f32.mrf.mxu2  ;;  %v3563_v33 = vadd.f32 %v1560_v16, %v3450_v35 }
 0x6b1   : > { %v3478_v37 = vadd.f32 %v1551_v17, %v1511_v50  ;;  %v1593_v17 = vmul.f32 %v3548_v18, %v3548_v18  ;;  %v1564_v50 = vld [vmem:[%s3468_s12 + $0x68] sm:$0xff] }
 0x6b2   : > { %v1464_v36 = vpop.f32.mrf.mxu0 }
 0x6b3   : > { %v3480_v5 = vadd.f32 %v1552_v34, %v1464_v36  ;;  %v1855_v54 = vmul.f32 %v3478_v37, %v3478_v37  ;;  %v3566_v36 = vadd.f32 %v1564_v50, %v3458_v3 }
 0x6b5   : > { %v1584_v57 = vmul.f32 %v3480_v5, %v3480_v5 }
 0x6b7   : > { %1871 = vadd.xlane.f32.xlu1 %v1855_v54  ;;  %1601 = vadd.xlane.f32.xlu2 %v1584_v57  ;;  %v1596_v57 = vmul.f32 %v3566_v36, %v3566_v36 }
 0x6b8   : > { %v1513_v13 = vpop.f32.mrf.mxu2 }
 0x6b9   : > { %v3489_v0 = vadd.f32 %v1552_v34, %v1513_v13  ;;  %v1562_v34 = vld [vmem:[%s3468_s12 + $0x58] sm:$0xff]  ;;  %v1592_v13 = vmul.f32 %v3563_v33, %v3563_v33 }
 0x6ba   : > { %v1467_v43 = vpop.f32.mrf.mxu0  ;;  %v3569_v54 = vadd.f32 %v1562_v34, %v3454_v59  ;;  %v3583_v59 = vadd.f32 %v1557_v63, %v3471_v62  ;;  %v3602_v62 = vadd.f32 %v1558_v26, %v3482_v44  ;;  %v3616_v44 = vadd.f32 %v1561_v29, %v3520_v23 }
 0x6bb   : > { %v3491_v7 = vadd.f32 %v1553_v2, %v1467_v43  ;;  %v1856_v21 = vmul.f32 %v3489_v0, %v3489_v0 }
 0x6bc   : > { %v1594_v43 = vmul.f32 %v3569_v54, %v3569_v54  ;;  %v1865_v26 = vmul.f32 %v3616_v44, %v3616_v44 }
 0x6bd   : > { %v1585_v14 = vmul.f32 %v3491_v7, %v3491_v7 }
 0x6bf   : > { %1873 = vadd.xlane.f32.xlu2 %v1856_v21  ;;  %1603 = vadd.xlane.f32.xlu0 %v1585_v14  ;;  %v1565_v21 = vld [vmem:[%s3468_s12 + $0x70] sm:$0xff]  ;;  %v1543_v14 = vpop.f32.mrf.mxu3 }
 0x6c0   : > { %v1516_v45 = vpop.f32.mrf.mxu2  ;;  %v3586_v3 = vadd.f32 %v1565_v21, %v3460_v31  ;;  %v3599_v31 = vadd.f32 %v1560_v16, %v3508_v15 }
 0x6c1   : > { %v3500_v12 = vadd.f32 %v1553_v2, %v1516_v45  ;;  %v1563_v2 = vld [vmem:[%s3468_s12 + $0x60] sm:$0xff]  ;;  %v1861_v45 = vmul.f32 %v3583_v59, %v3583_v59 }
 0x6c2   : > { %v1469_v46 = vpop.f32.mrf.mxu0  ;;  %v3580_v35 = vadd.f32 %v1563_v2, %v3456_v40  ;;  %v3613_v15 = vadd.f32 %v1563_v2, %v1541_v56 }
 0x6c3   : > { %v3502_v11 = vadd.f32 %v1554_v9, %v1469_v46  ;;  %v1857_v1 = vmul.f32 %v3500_v12, %v3500_v12  ;;  %v1566_v46 = vld [vmem:[%s3468_s12 + $0x78] sm:$0xff] }
 0x6c4   : > { %v3596_v40 = vadd.f32 %v1566_v46, %v3462_v30  ;;  %v3611_v30 = vadd.f32 %v1559_v61, %v3497_v52  ;;  %v3624_v52 = vadd.f32 %v1562_v34, %v1538_v38 }
 0x6c5   : > { %v1586_v6 = vmul.f32 %v3502_v11, %v3502_v11 }
 0x6c7   : > { %1875 = vadd.xlane.f32.xlu0 %v1857_v1  ;;  %1605 = vadd.xlane.f32.xlu2 %v1586_v6  ;;  %v1597_v1 = vmul.f32 %v3586_v3, %v3586_v3  ;;  %v1546_v6 = vpop.f32.mrf.mxu3 }
 0x6c8   : > { %v1518_v58 = vpop.f32.mrf.mxu2  ;;  %v3636_v63 = vadd.f32 %v1565_v21, %v1546_v6 }
 0x6c9   : > { %v3510_v53 = vadd.f32 %v1554_v9, %v1518_v58  ;;  %v1595_v9 = vmul.f32 %v3580_v35, %v3580_v35  ;;  %v1864_v58 = vmul.f32 %v3599_v31, %v3599_v31 }
 0x6ca   : > { %v1869_v29 = vmul.f32 %v3636_v63, %v3636_v63 }
 0x6cb   : > { %v1858_v39 = vmul.f32 %v3510_v53, %v3510_v53 }
 0x6cd   : > { %1877 = vadd.xlane.f32.xlu1 %v1858_v39  ;;  %v1598_v39 = vmul.f32 %v3596_v40, %v3596_v40 }
 0x6d0   : > { %v1521_v55 = vpop.f32.mrf.mxu2 }
 0x6d1   : > { %v3518_v41 = vadd.f32 %v1555_v47, %v1521_v55  ;;  %v1862_v47 = vmul.f32 %v3602_v62, %v3602_v62  ;;  %v1867_v55 = vmul.f32 %v3613_v15, %v3613_v15 }
 0x6d3   : > { %v1859_v48 = vmul.f32 %v3518_v41, %v3518_v41 }
 0x6d5   : > { %1607 = vadd.xlane.f32.xlu1 %v1587_v4  ;;  %1879 = vadd.xlane.f32.xlu2 %v1859_v48  ;;  %v1863_v4 = vmul.f32 %v3611_v30, %v3611_v30  ;;  %v1548_v48 = vpop.f32.mrf.mxu3 }
 0x6d8   : > { %v1523_v10 = vpop.f32.mrf.mxu2 }
 0x6d9   : > { %v3533_v19 = vadd.f32 %v1556_v27, %v1523_v10  ;;  %v3626_v27 = vadd.f32 %v1566_v46, %v1548_v48  ;;  %v3628_v10 = vadd.f32 %v1564_v50, %v1543_v14 }
 0x6db   : > { %v1860_v42 = vmul.f32 %v3533_v19, %v3533_v19  ;;  %v1870_v23 = vmul.f32 %v3626_v27, %v3626_v27 }
 0x6dd   : > { %1613 = vadd.xlane.f32.xlu1 %v1590_v22  ;;  %1881 = vadd.xlane.f32.xlu0 %v1860_v42  ;;  %v1866_v22 = vmul.f32 %v3624_v52, %v3624_v52  ;;  %v1868_v42 = vmul.f32 %v3628_v10, %v3628_v10 }
 0x6de   : > { %1609 = vadd.xlane.f32.xlu2 %v1588_v28 }
 0x6e5   : > { %1619 = vadd.xlane.f32.xlu1 %v1593_v17  ;;  %1611 = vadd.xlane.f32.xlu0 %v1589_v24 }
 0x6e6   : > { %1615 = vadd.xlane.f32.xlu2 %v1591_v49 }
 0x6ed   : > { %1625 = vadd.xlane.f32.xlu1 %v1596_v57  ;;  %1617 = vadd.xlane.f32.xlu0 %v1592_v13 }
 0x6ee   : > { %1621 = vadd.xlane.f32.xlu2 %v1594_v43 }
 0x6f5   : > { %1883 = vadd.xlane.f32.xlu1 %v1861_v45  ;;  %1623 = vadd.xlane.f32.xlu0 %v1595_v9 }
 0x6f6   : > { %1627 = vadd.xlane.f32.xlu2 %v1597_v1 }
 0x6fd   : > { %1889 = vadd.xlane.f32.xlu1 %v1864_v58  ;;  %1629 = vadd.xlane.f32.xlu0 %v1598_v39 }
 0x6fe   : > { %1885 = vadd.xlane.f32.xlu2 %v1862_v47 }
 0x705   : > { %1895 = vadd.xlane.f32.xlu1 %v1867_v55  ;;  %1887 = vadd.xlane.f32.xlu0 %v1863_v4 }
 0x706   : > { %1891 = vadd.xlane.f32.xlu2 %v1865_v26 }
 0x70d   : > { %1901 = vadd.xlane.f32.xlu1 %v1870_v23  ;;  %1893 = vadd.xlane.f32.xlu0 %v1866_v22 }
 0x70e   : > { %1897 = vadd.xlane.f32.xlu2 %v1868_v42 }
 0x715   : > { %1899 = vadd.xlane.f32.xlu0 %v1869_v29 }
 0x722   : > { %v1600_v38 = vpop.xlane.xlu1 %1599 }
 0x723   : > { %v1631_v28 = vmax.f32 %v1600_v38, 1e-24 }
 0x725   : > { %2561 = vrsqrt.f32 %v1631_v28  ;;  %vm1653_vm3 = vweird.f32 %v1631_v28 }
 0x72a   : > { %v1872_v61 = vpop.xlane.xlu1 %1871  ;;  %v1602_v17 = vpop.xlane.xlu2 %1601 }
 0x72b   : > { %v2562_v24 = vpop.eup %2561  ;;  %v1903_v16 = vmax.f32 %v1872_v61, 1e-24  ;;  %v1632_v50 = vmax.f32 %v1602_v17, 1e-24 }
 0x72c   : > { %v1648_v49 = vmul.f32 %v2562_v24, %v1631_v28  ;;  %vm1654_vm2 = vweird.f32 %v2562_v24 }
 0x72d   : > { %2563 = vrsqrt.f32 %v1903_v16  ;;  %vm1655_vm4 = vmor %vm1653_vm3, %vm1654_vm2  ;;  %vm1925_vm7 = vweird.f32 %v1903_v16  ;;  %vm1663_vm9 = vweird.f32 %v1632_v50 }
 0x72e   : > { %v1649_v34 = vmul.f32 %v2562_v24, %v1648_v49  ;;  %2565 = vrsqrt.f32 %v1632_v50 }
 0x730   : > { %v1650_v56 = vmul.f32 0.5, %v1649_v34 }
 0x732   : > { %v1651_v57 = vsub.f32 1.5, %v1650_v56  ;;  %v1604_v13 = vpop.xlane.xlu0 %1603  ;;  %v1874_v2 = vpop.xlane.xlu2 %1873 }
 0x733   : > { %v2564_v43 = vpop.eup %2563  ;;  %v1633_v21 = vmax.f32 %v1604_v13, 1e-24  ;;  %v3643_v14 = vmax.f32 %v1874_v2, 1e-24 }
 0x734   : > { %v2566_v45 = vpop.eup %2565  ;;  %v1652_v9 = vmul.f32 %v2562_v24, %v1651_v57  ;;  %v1920_v46 = vmul.f32 %v2564_v43, %v1903_v16  ;;  %vm1926_vm5 = vweird.f32 %v2564_v43 }
 0x735   : > { %v1658_v1 = vmul.f32 %v2566_v45, %v1632_v50  ;;  %2567 = vrsqrt.f32 %v1633_v21  ;;  %vm1664_vm6 = vweird.f32 %v2566_v45  ;;  %vm1927_vm8 = vmor %vm1925_vm7, %vm1926_vm5  ;;  %vm1673_vm13 = vweird.f32 %v1633_v21 }
 0x736   : > { %v1656_v6 = vsel %vm1655_vm4, %v2562_v24, %v1652_v9  ;;  %v1921_v58 = vmul.f32 %v2564_v43, %v1920_v46  ;;  %2569 = vrsqrt.f32 %v3643_v14  ;;  %vm1665_vm10 = vmor %vm1663_vm9, %vm1664_vm6  ;;  %vm1935_vm15 = vweird.f32 %v3643_v14 }
 0x737   : > { %v1807_v39 = vmul.f32 %v1656_v6, %v3473_v25  ;;  %v1659_v47 = vmul.f32 %v2566_v45, %v1658_v1 }
 0x738   : > { %v1922_v55 = vmul.f32 0.5, %v1921_v58 }
 0x739   : > { %1823 = vst [vmem:[%s3647_s14] sm:$0xff] %v1807_v39  ;;  %v1660_v4 = vmul.f32 0.5, %v1659_v47 }
 0x73a   : > { %v1923_v48 = vsub.f32 1.5, %v1922_v55  ;;  %v1876_v26 = vpop.xlane.xlu0 %1875  ;;  %v1606_v23 = vpop.xlane.xlu2 %1605 }
 0x73b   : > { %v2568_v22 = vpop.eup %2567  ;;  %v1661_v42 = vsub.f32 1.5, %v1660_v4  ;;  %v3650_v29 = vmax.f32 %v1876_v26, 1e-24  ;;  %v3652_v38 = vmax.f32 %v1606_v23, 1e-24 }
 0x73c   : > { %v2570_v28 = vpop.eup %2569  ;;  %v1924_v25 = vmul.f32 %v2564_v43, %v1923_v48  ;;  %v1668_v61 = vmul.f32 %v2568_v22, %v1633_v21  ;;  %vm1674_vm11 = vweird.f32 %v2568_v22 }
 0x73d   : > { %v1662_v17 = vmul.f32 %v2566_v45, %v1661_v42  ;;  %v1930_v24 = vmul.f32 %v2570_v28, %v3643_v14  ;;  %2571 = vrsqrt.f32 %v3650_v29  ;;  %vm1936_vm12 = vweird.f32 %v2570_v28  ;;  %vm1675_vm14 = vmor %vm1673_vm13, %vm1674_vm11 }
 0x73e   : > { %v1928_v49 = vsel %vm1927_vm8, %v2564_v43, %v1924_v25  ;;  %v1669_v34 = vmul.f32 %v2568_v22, %v1668_v61  ;;  %2573 = vrsqrt.f32 %v3652_v38  ;;  %vm1937_vm0 = vmor %vm1935_vm15, %vm1936_vm12  ;;  %vm1945_vm3 = vweird.f32 %v3650_v29 }
 0x73f   : > { %v2079_v56 = vmul.f32 %v1928_v49, %v3478_v37  ;;  %v1666_v57 = vsel %vm1665_vm10, %v2566_v45, %v1662_v17  ;;  %v1931_v13 = vmul.f32 %v2570_v28, %v1930_v24  ;;  %vm1683_vm5 = vweird.f32 %v3652_v38 }
 0x740   : > { %v1808_v16 = vmul.f32 %v1666_v57, %v3480_v5  ;;  %v1670_v2 = vmul.f32 0.5, %v1669_v34  ;;  %v1878_v9 = vpop.xlane.xlu1 %1877 }
 0x741   : > { %2095 = vst [vmem:[%s3647_s14 + $0x8] sm:$0xff] %v2079_v56  ;;  %v1932_v50 = vmul.f32 0.5, %v1931_v13  ;;  %v3660_v46 = vmax.f32 %v1878_v9, 1e-24 }
 0x742   : > { %1824 = vst [vmem:[%s3647_s14 + $0x10] sm:$0xff] %v1808_v16  ;;  %v1671_v1 = vsub.f32 1.5, %v1670_v2 }
 0x743   : > { %v2572_v43 = vpop.eup %2571  ;;  %v1933_v6 = vsub.f32 1.5, %v1932_v50  ;;  %2575 = vrsqrt.f32 %v3660_v46  ;;  %vm1955_vm8 = vweird.f32 %v3660_v46 }
 0x744   : > { %v2574_v58 = vpop.eup %2573  ;;  %v1672_v37 = vmul.f32 %v2568_v22, %v1671_v1  ;;  %v1940_v45 = vmul.f32 %v2572_v43, %v3650_v29  ;;  %vm1946_vm1 = vweird.f32 %v2572_v43 }
 0x745   : > { %v1934_v5 = vmul.f32 %v2570_v28, %v1933_v6  ;;  %v1678_v39 = vmul.f32 %v2574_v58, %v3652_v38  ;;  %vm1684_vm2 = vweird.f32 %v2574_v58  ;;  %vm1947_vm4 = vmor %vm1945_vm3, %vm1946_vm1 }
 0x746   : > { %v1676_v47 = vsel %vm1675_vm14, %v2568_v22, %v1672_v37  ;;  %v1941_v55 = vmul.f32 %v2572_v43, %v1940_v45  ;;  %vm1685_vm6 = vmor %vm1683_vm5, %vm1684_vm2 }
 0x747   : > { %v1809_v4 = vmul.f32 %v1676_v47, %v3491_v7  ;;  %v1938_v48 = vsel %vm1937_vm0, %v2570_v28, %v1934_v5  ;;  %v1679_v26 = vmul.f32 %v2574_v58, %v1678_v39 }
 0x748   : > { %v2080_v23 = vmul.f32 %v1938_v48, %v3489_v0  ;;  %v1942_v21 = vmul.f32 0.5, %v1941_v55  ;;  %v1608_v42 = vpop.xlane.xlu1 %1607  ;;  %v1880_v25 = vpop.xlane.xlu2 %1879 }
 0x749   : > { %v2576_v61 = vpop.eup %2575  ;;  %1825 = vst [vmem:[%s3647_s14 + $0x20] sm:$0xff] %v1809_v4  ;;  %v1680_v17 = vmul.f32 0.5, %v1679_v26  ;;  %v3670_v24 = vmax.f32 %v1608_v42, 1e-24  ;;  %v3672_v14 = vmax.f32 %v1880_v25, 1e-24 }
 0x74a   : > { %2096 = vst [vmem:[%s3647_s14 + $0x18] sm:$0xff] %v2080_v23  ;;  %v1943_v22 = vsub.f32 1.5, %v1942_v21  ;;  %v1950_v49 = vmul.f32 %v2576_v61, %v3660_v46  ;;  %vm1956_vm7 = vweird.f32 %v2576_v61 }
 0x74b   : > { %v1681_v7 = vsub.f32 1.5, %v1680_v17  ;;  %2577 = vrsqrt.f32 %v3670_v24  ;;  %vm1957_vm9 = vmor %vm1955_vm8, %vm1956_vm7  ;;  %vm1693_vm11 = vweird.f32 %v3670_v24  ;;  %vm1965_vm13 = vweird.f32 %v3672_v14 }
 0x74c   : > { %v1944_v0 = vmul.f32 %v2572_v43, %v1943_v22  ;;  %v1951_v28 = vmul.f32 %v2576_v61, %v1950_v49  ;;  %2579 = vrsqrt.f32 %v3672_v14 }
 0x74d   : > { %v1682_v34 = vmul.f32 %v2574_v58, %v1681_v7 }
 0x74e   : > { %v1948_v56 = vsel %vm1947_vm4, %v2572_v43, %v1944_v0  ;;  %v1952_v57 = vmul.f32 0.5, %v1951_v28 }
 0x74f   : > { %v2081_v13 = vmul.f32 %v1948_v56, %v3500_v12  ;;  %v1686_v16 = vsel %vm1685_vm6, %v2574_v58, %v1682_v34 }
 0x750   : > { %v1810_v2 = vmul.f32 %v1686_v16, %v3502_v11  ;;  %v1953_v9 = vsub.f32 1.5, %v1952_v57  ;;  %v1614_v29 = vpop.xlane.xlu1 %1613  ;;  %v1882_v50 = vpop.xlane.xlu0 %1881 }
 0x751   : > { %v2578_v1 = vpop.eup %2577  ;;  %2097 = vst [vmem:[%s3647_s14 + $0x28] sm:$0xff] %v2081_v13  ;;  %v3683_v6 = vmax.f32 %v1614_v29, 1e-24  ;;  %v3685_v37 = vmax.f32 %v1882_v50, 1e-24  ;;  %v1610_v38 = vpop.xlane.xlu2 %1609 }
 0x752   : > { %v2580_v43 = vpop.eup %2579  ;;  %1826 = vst [vmem:[%s3647_s14 + $0x30] sm:$0xff] %v1810_v2  ;;  %v1954_v45 = vmul.f32 %v2576_v61, %v1953_v9  ;;  %v1688_v12 = vmul.f32 %v2578_v1, %v3670_v24  ;;  %v3690_v11 = vmax.f32 %v1610_v38, 1e-24  ;;  %vm1694_vm10 = vweird.f32 %v2578_v1 }
 0x753   : > { %v1960_v58 = vmul.f32 %v2580_v43, %v3672_v14  ;;  %2581 = vrsqrt.f32 %v3683_v6  ;;  %vm1966_vm12 = vweird.f32 %v2580_v43  ;;  %vm1695_vm14 = vmor %vm1693_vm11, %vm1694_vm10  ;;  %vm1723_vm0 = vweird.f32 %v3683_v6 }
 0x754   : > { %v1958_v5 = vsel %vm1957_vm9, %v2576_v61, %v1954_v45  ;;  %v1689_v39 = vmul.f32 %v2578_v1, %v1688_v12  ;;  %2583 = vrsqrt.f32 %v3685_v37  ;;  %vm1967_vm15 = vmor %vm1965_vm13, %vm1966_vm12  ;;  %vm1975_vm5 = vweird.f32 %v3685_v37 }
 0x755   : > { %v2082_v47 = vmul.f32 %v1958_v5, %v3510_v53  ;;  %v1961_v55 = vmul.f32 %v2580_v43, %v1960_v58  ;;  %2585 = vrsqrt.f32 %v3690_v11  ;;  %vm1703_vm6 = vweird.f32 %v3690_v11 }
 0x756   : > { %v1690_v4 = vmul.f32 0.5, %v1689_v39 }
 0x757   : > { %2098 = vst [vmem:[%s3647_s14 + $0x38] sm:$0xff] %v2082_v47  ;;  %v1962_v46 = vmul.f32 0.5, %v1961_v55 }
 0x758   : > { %v1691_v48 = vsub.f32 1.5, %v1690_v4  ;;  %v1620_v26 = vpop.xlane.xlu1 %1619  ;;  %v1612_v23 = vpop.xlane.xlu0 %1611 }
 0x759   : > { %v2582_v21 = vpop.eup %2581  ;;  %v1963_v42 = vsub.f32 1.5, %v1962_v46  ;;  %v3699_v25 = vmax.f32 %v1620_v26, 1e-24  ;;  %v1616_v61 = vpop.xlane.xlu2 %1615  ;;  %v3703_v49 = vmax.f32 %v1612_v23, 1e-24 }
 0x75a   : > { %v2584_v17 = vpop.eup %2583  ;;  %v1692_v53 = vmul.f32 %v2578_v1, %v1691_v48  ;;  %v1718_v22 = vmul.f32 %v2582_v21, %v3683_v6  ;;  %v3708_v28 = vmax.f32 %v1616_v61, 1e-24  ;;  %vm1724_vm1 = vweird.f32 %v2582_v21 }
 0x75b   : > { %v2586_v7 = vpop.eup %2585  ;;  %v1964_v0 = vmul.f32 %v2580_v43, %v1963_v42  ;;  %v1970_v24 = vmul.f32 %v2584_v17, %v3685_v37  ;;  %2587 = vrsqrt.f32 %v3699_v25  ;;  %vm1976_vm2 = vweird.f32 %v2584_v17  ;;  %vm1725_vm4 = vmor %vm1723_vm0, %vm1724_vm1 }
 0x75c   : > { %v1696_v34 = vsel %vm1695_vm14, %v2578_v1, %v1692_v53  ;;  %v1719_v14 = vmul.f32 %v2582_v21, %v1718_v22  ;;  %v1698_v56 = vmul.f32 %v2586_v7, %v3690_v11  ;;  %2589 = vrsqrt.f32 %v3703_v49  ;;  %vm1977_vm7 = vmor %vm1975_vm5, %vm1976_vm2 }
 0x75d   : > { %v1811_v57 = vmul.f32 %v1696_v34, %v3516_v32  ;;  %v1968_v13 = vsel %vm1967_vm15, %v2580_v43, %v1964_v0  ;;  %v1971_v16 = vmul.f32 %v2584_v17, %v1970_v24  ;;  %2591 = vrsqrt.f32 %v3708_v28 }
 0x75e   : > { %v2083_v2 = vmul.f32 %v1968_v13, %v3518_v41  ;;  %v1720_v9 = vmul.f32 0.5, %v1719_v14  ;;  %v1699_v29 = vmul.f32 %v2586_v7, %v1698_v56  ;;  %vm1704_vm3 = vweird.f32 %v2586_v7 }
 0x75f   : > { %1827 = vst [vmem:[%s3647_s14 + $0x40] sm:$0xff] %v1811_v57  ;;  %v1972_v50 = vmul.f32 0.5, %v1971_v16  ;;  %vm1705_vm8 = vmor %vm1703_vm6, %vm1704_vm3  ;;  %vm1753_vm10 = vweird.f32 %v3699_v25  ;;  %vm1713_vm11 = vweird.f32 %v3703_v49  ;;  %vm1733_vm0 = vweird.f32 %v3708_v28 }
 0x760   : > { %2099 = vst [vmem:[%s3647_s14 + $0x48] sm:$0xff] %v2083_v2  ;;  %v1721_v1 = vsub.f32 1.5, %v1720_v9  ;;  %v1700_v38 = vmul.f32 0.5, %v1699_v29  ;;  %v1626_v45 = vpop.xlane.xlu1 %1625  ;;  %v1618_v32 = vpop.xlane.xlu0 %1617 }
 0x761   : > { %v2588_v43 = vpop.eup %2587  ;;  %v1973_v12 = vsub.f32 1.5, %v1972_v50  ;;  %v3719_v41 = vmax.f32 %v1626_v45, 1e-24  ;;  %v3721_v58 = vmax.f32 %v1618_v32, 1e-24  ;;  %v1622_v5 = vpop.xlane.xlu2 %1621 }
 0x762   : > { %v1722_v39 = vmul.f32 %v2582_v21, %v1721_v1  ;;  %v1701_v47 = vsub.f32 1.5, %v1700_v38  ;;  %v1748_v55 = vmul.f32 %v2588_v43, %v3699_v25  ;;  %v3729_v46 = vpop.eup %2589  ;;  %vm1754_vm9 = vweird.f32 %v2588_v43 }
 0x763   : > { %v1974_v4 = vmul.f32 %v2584_v17, %v1973_v12  ;;  %2593 = vrsqrt.f32 %v3719_v41  ;;  %v3733_v6 = vpop.eup %2591  ;;  %v1708_v11 = vmul.f32 %v3729_v46, %v3703_v49  ;;  %vm1755_vm12 = vmor %vm1753_vm10, %vm1754_vm9  ;;  %vm1714_vm13 = vweird.f32 %v3729_v46 }
 0x764   : > { %v1726_v48 = vsel %vm1725_vm4, %v2582_v21, %v1722_v39  ;;  %v1702_v26 = vmul.f32 %v2586_v7, %v1701_v47  ;;  %v1749_v23 = vmul.f32 %v2588_v43, %v1748_v55  ;;  %2595 = vrsqrt.f32 %v3721_v58  ;;  %vm1715_vm15 = vmor %vm1713_vm11, %vm1714_vm13 }
 0x765   : > { %v1814_v42 = vmul.f32 %v1726_v48, %v3528_v51  ;;  %v1978_v37 = vsel %vm1977_vm7, %v2584_v17, %v1974_v4  ;;  %v1728_v22 = vmul.f32 %v3733_v6, %v3708_v28  ;;  %v1709_v24 = vmul.f32 %v3729_v46, %v1708_v11 }
 0x766   : > { %v2084_v21 = vmul.f32 %v1978_v37, %v3533_v19  ;;  %v1706_v61 = vsel %vm1705_vm8, %v2586_v7, %v1702_v26  ;;  %v1750_v53 = vmul.f32 0.5, %v1749_v23  ;;  %v3745_v51 = vmax.f32 %v1622_v5, 1e-24 }
 0x767   : > { %1830 = vst [vmem:[%s3647_s14 + $0x70] sm:$0xff] %v1814_v42  ;;  %v1812_v0 = vmul.f32 %v1706_v61, %v3531_v8  ;;  %v1729_v34 = vmul.f32 %v3733_v6, %v1728_v22  ;;  %v1710_v7 = vmul.f32 0.5, %v1709_v24  ;;  %vm1734_vm14 = vweird.f32 %v3733_v6 }
 0x768   : > { %2100 = vst [vmem:[%s3647_s14 + $0x58] sm:$0xff] %v2084_v21  ;;  %v1751_v17 = vsub.f32 1.5, %v1750_v53  ;;  %v1884_v14 = vpop.xlane.xlu1 %1883  ;;  %v1624_v56 = vpop.xlane.xlu0 %1623  ;;  %2597 = vrsqrt.f32 %v3745_v51  ;;  %vm1735_vm1 = vmor %vm1733_vm0, %vm1734_vm14  ;;  %vm1783_vm4 = vweird.f32 %v3719_v41  ;;  %vm1743_vm6 = vweird.f32 %v3721_v58 }
 0x769   : > { %v3749_v19 = vpop.eup %2593  ;;  %1828 = vst [vmem:[%s3647_s14 + $0x50] sm:$0xff] %v1812_v0  ;;  %v3754_v8 = vmax.f32 %v1884_v14, 1e-24  ;;  %v1628_v57 = vpop.xlane.xlu2 %1627  ;;  %v1730_v2 = vmul.f32 0.5, %v1729_v34  ;;  %v1711_v29 = vsub.f32 1.5, %v1710_v7  ;;  %vm1763_vm9 = vweird.f32 %v3745_v51 }
 0x76a   : > { %v3756_v13 = vpop.eup %2595  ;;  %v1752_v16 = vmul.f32 %v2588_v43, %v1751_v17  ;;  %v1778_v9 = vmul.f32 %v3749_v19, %v3719_v41  ;;  %v3771_v5 = vmax.f32 %v1624_v56, 1e-24  ;;  %v3777_v47 = vmax.f32 %v1628_v57, 1e-24 }
 0x76b   : > { %v1738_v25 = vmul.f32 %v3756_v13, %v3721_v58  ;;  %2599 = vrsqrt.f32 %v3754_v8  ;;  %v1731_v1 = vsub.f32 1.5, %v1730_v2  ;;  %v1712_v32 = vmul.f32 %v3729_v46, %v1711_v29 }
 0x76c   : > { %v1756_v50 = vsel %vm1755_vm12, %v2588_v43, %v1752_v16  ;;  %v1779_v38 = vmul.f32 %v3749_v19, %v1778_v9  ;;  %vm1784_vm2 = vweird.f32 %v3749_v19  ;;  %2601 = vrsqrt.f32 %v3771_v5 }
 0x76d   : > { %v1817_v45 = vmul.f32 %v1756_v50, %v3548_v18  ;;  %v1739_v12 = vmul.f32 %v3756_v13, %v1738_v25  ;;  %v1732_v39 = vmul.f32 %v3733_v6, %v1731_v1  ;;  %v1716_v18 = vsel %vm1715_vm15, %v3729_v46, %v1712_v32  ;;  %vm1785_vm5 = vmor %vm1783_vm4, %vm1784_vm2 }
 0x76e   : > { %v1780_v43 = vmul.f32 0.5, %v1779_v38  ;;  %v3779_v55 = vpop.eup %2597  ;;  %v1813_v49 = vmul.f32 %v1716_v18, %v3545_v60  ;;  %vm1744_vm3 = vweird.f32 %v3756_v13  ;;  %2603 = vrsqrt.f32 %v3777_v47 }
 0x76f   : > { %1833 = vst [vmem:[%s3647_s14 + $0xa0] sm:$0xff] %v1817_v45  ;;  %v1740_v4 = vmul.f32 0.5, %v1739_v12  ;;  %v1736_v48 = vsel %vm1735_vm1, %v3733_v6, %v1732_v39  ;;  %v1758_v26 = vmul.f32 %v3779_v55, %v3745_v51  ;;  %vm1745_vm7 = vmor %vm1743_vm6, %vm1744_vm3  ;;  %vm1764_vm8 = vweird.f32 %v3779_v55 }
 0x770   : > { %v1781_v28 = vsub.f32 1.5, %v1780_v43  ;;  %v1890_v23 = vpop.xlane.xlu1 %1889  ;;  %v1630_v42 = vpop.xlane.xlu0 %1629  ;;  %v1815_v46 = vmul.f32 %v1736_v48, %v3551_v20  ;;  %1829 = vst [vmem:[%s3647_s14 + $0x60] sm:$0xff] %v1813_v49  ;;  %vm1765_vm11 = vmor %vm1763_vm9, %vm1764_vm8  ;;  %vm1985_vm12 = vweird.f32 %v3754_v8  ;;  %vm1773_vm14 = vweird.f32 %v3771_v5 }
 0x771   : > { %v3789_v37 = vpop.eup %2599  ;;  %v1741_v11 = vsub.f32 1.5, %v1740_v4  ;;  %v1886_v21 = vpop.xlane.xlu2 %1885  ;;  %v1759_v6 = vmul.f32 %v3779_v55, %v1758_v26  ;;  %v3805_v53 = vmax.f32 %v1890_v23, 1e-24  ;;  %v3807_v22 = vmax.f32 %v1630_v42, 1e-24 }
 0x772   : > { %v1782_v60 = vmul.f32 %v3749_v19, %v1781_v28  ;;  %v1980_v61 = vmul.f32 %v3789_v37, %v3754_v8  ;;  %1831 = vst [vmem:[%s3647_s14 + $0x80] sm:$0xff] %v1815_v46  ;;  %v3814_v17 = vpop.eup %2601  ;;  %v3819_v14 = vmax.f32 %v1886_v21, 1e-24  ;;  %vm1986_vm10 = vweird.f32 %v3789_v37 }
 0x773   : > { %v1742_v20 = vmul.f32 %v3756_v13, %v1741_v11  ;;  %v1760_v0 = vmul.f32 0.5, %v1759_v6  ;;  %2605 = vrsqrt.f32 %v3805_v53  ;;  %v1768_v57 = vmul.f32 %v3814_v17, %v3771_v5  ;;  %vm1987_vm13 = vmor %vm1985_vm12, %vm1986_vm10 }
 0x774   : > { %v1786_v41 = vsel %vm1785_vm5, %v3749_v19, %v1782_v60  ;;  %v1981_v24 = vmul.f32 %v3789_v37, %v1980_v61  ;;  %v3824_v16 = vpop.eup %2603  ;;  %2607 = vrsqrt.f32 %v3807_v22  ;;  %vm1774_vm15 = vweird.f32 %v3814_v17 }
 0x775   : > { %v1820_v58 = vmul.f32 %v1786_v41, %v3566_v36  ;;  %v1746_v34 = vsel %vm1745_vm7, %v3756_v13, %v1742_v20  ;;  %v1761_v19 = vsub.f32 1.5, %v1760_v0  ;;  %v1788_v2 = vmul.f32 %v3824_v16, %v3777_v47  ;;  %vm1775_vm1 = vmor %vm1773_vm14, %vm1774_vm15 }
 0x776   : > { %v1816_v56 = vmul.f32 %v1746_v34, %v3563_v33  ;;  %v1982_v7 = vmul.f32 0.5, %v1981_v24  ;;  %v1769_v33 = vmul.f32 %v3814_v17, %v1768_v57  ;;  %2609 = vrsqrt.f32 %v3819_v14 }
 0x777   : > { %1836 = vst [vmem:[%s3647_s14 + $0xd0] sm:$0xff] %v1820_v58  ;;  %v1762_v36 = vmul.f32 %v3779_v55, %v1761_v19  ;;  %v1789_v45 = vmul.f32 %v3824_v16, %v1788_v2  ;;  %vm1794_vm0 = vweird.f32 %v3824_v16  ;;  %vm1793_vm2 = vweird.f32 %v3777_v47 }
 0x778   : > { %1832 = vst [vmem:[%s3647_s14 + $0x90] sm:$0xff] %v1816_v56  ;;  %v1983_v13 = vsub.f32 1.5, %v1982_v7  ;;  %v1896_v9 = vpop.xlane.xlu1 %1895  ;;  %v1888_v29 = vpop.xlane.xlu0 %1887  ;;  %v1770_v38 = vmul.f32 0.5, %v1769_v33  ;;  %vm2015_vm3 = vweird.f32 %v3805_v53  ;;  %vm1803_vm4 = vweird.f32 %v3807_v22  ;;  %vm1795_vm5 = vmor %vm1793_vm2, %vm1794_vm0 }
 0x779   : > { %v3839_v51 = vmax.f32 %v1896_v9, 1e-24  ;;  %v3841_v25 = vmax.f32 %v1888_v29, 1e-24  ;;  %v1766_v50 = vsel %vm1765_vm11, %v3779_v55, %v1762_v36  ;;  %v1892_v32 = vpop.xlane.xlu2 %1891  ;;  %v3846_v12 = vpop.eup %2605  ;;  %v1790_v55 = vmul.f32 0.5, %v1789_v45 }
 0x77a   : > { %v1984_v1 = vmul.f32 %v3789_v37, %v1983_v13  ;;  %v1818_v39 = vmul.f32 %v1766_v50, %v3569_v54  ;;  %v1771_v43 = vsub.f32 1.5, %v1770_v38  ;;  %v2010_v18 = vmul.f32 %v3846_v12, %v3805_v53  ;;  %v3857_v4 = vpop.eup %2607 }
 0x77b   : > { %2611 = vrsqrt.f32 %v3839_v51  ;;  %v3863_v49 = vmax.f32 %v1892_v32, 1e-24  ;;  %v1791_v28 = vsub.f32 1.5, %v1790_v55  ;;  %v1798_v23 = vmul.f32 %v3857_v4, %v3807_v22 }
 0x77c   : > { %v1988_v8 = vsel %vm1987_vm13, %v3789_v37, %v1984_v1  ;;  %1834 = vst [vmem:[%s3647_s14 + $0xb0] sm:$0xff] %v1818_v39  ;;  %2613 = vrsqrt.f32 %v3841_v25  ;;  %v1772_v48 = vmul.f32 %v3814_v17, %v1771_v43  ;;  %v2011_v26 = vmul.f32 %v3846_v12, %v2010_v18  ;;  %v3869_v42 = vpop.eup %2609 }
 0x77d   : > { %v2085_v54 = vmul.f32 %v1988_v8, %v3583_v59  ;;  %2615 = vrsqrt.f32 %v3863_v49  ;;  %v1792_v37 = vmul.f32 %v3824_v16, %v1791_v28  ;;  %v1799_v11 = vmul.f32 %v3857_v4, %v1798_v23 }
 0x77e   : > { %v1776_v59 = vsel %vm1775_vm1, %v3814_v17, %v1772_v48  ;;  %v2012_v46 = vmul.f32 0.5, %v2011_v26  ;;  %vm2016_vm6 = vweird.f32 %v3846_v12  ;;  %v1990_v6 = vmul.f32 %v3869_v42, %v3819_v14 }
 0x77f   : > { %2101 = vst [vmem:[%s3647_s14 + $0x68] sm:$0xff] %v2085_v54  ;;  %v1819_v47 = vmul.f32 %v1776_v59, %v3580_v35  ;;  %vm1995_vm7 = vweird.f32 %v3819_v14  ;;  %v1796_v20 = vsel %vm1795_vm5, %v3824_v16, %v1792_v37  ;;  %v1800_v0 = vmul.f32 0.5, %v1799_v11  ;;  %vm2017_vm9 = vmor %vm2015_vm3, %vm2016_vm6 }
 0x780   : > { %v1902_v21 = vpop.xlane.xlu1 %1901  ;;  %v1894_v60 = vpop.xlane.xlu0 %1893  ;;  %v2013_v41 = vsub.f32 1.5, %v2012_v46  ;;  %v1821_v17 = vmul.f32 %v1796_v20, %v3586_v3  ;;  %vm1804_vm8 = vweird.f32 %v3857_v4  ;;  %v1991_v58 = vmul.f32 %v3869_v42, %v1990_v6 }
 0x781   : > { %v3883_v5 = vpop.eup %2611  ;;  %v3892_v61 = vmax.f32 %v1902_v21, 1e-24  ;;  %1835 = vst [vmem:[%s3647_s14 + $0xc0] sm:$0xff] %v1819_v47  ;;  %v1801_v56 = vsub.f32 1.5, %v1800_v0  ;;  %vm1996_vm10 = vweird.f32 %v3869_v42  ;;  %vm2045_vm11 = vweird.f32 %v3839_v51  ;;  %vm1805_vm12 = vmor %vm1803_vm4, %vm1804_vm8  ;;  %v1898_v45 = vpop.xlane.xlu2 %1897 }
 0x782   : > { %v2040_v35 = vmul.f32 %v3883_v5, %v3839_v51  ;;  %v3897_v24 = vpop.eup %2613  ;;  %v2014_v34 = vmul.f32 %v3846_v12, %v2013_v41  ;;  %1837 = vst [vmem:[%s3647_s14 + $0xe0] sm:$0xff] %v1821_v17  ;;  %v1992_v3 = vmul.f32 0.5, %v1991_v58  ;;  %v3917_v16 = vmax.f32 %v1894_v60, 1e-24  ;;  %vm1997_vm15 = vmor %vm1995_vm7, %vm1996_vm10 }
 0x783   : > { %2617 = vrsqrt.f32 %v3892_v61  ;;  %v2000_v7 = vmul.f32 %v3897_v24, %v3841_v25  ;;  %v3908_v57 = vpop.eup %2615  ;;  %v1802_v13 = vmul.f32 %v3857_v4, %v1801_v56  ;;  %vm2046_vm13 = vweird.f32 %v3883_v5 }
 0x784   : > { %v2041_v19 = vmul.f32 %v3883_v5, %v2040_v35  ;;  %v2018_v36 = vsel %vm2017_vm9, %v3846_v12, %v2014_v34  ;;  %v1993_v53 = vsub.f32 1.5, %v1992_v3  ;;  %v2020_v29 = vmul.f32 %v3908_v57, %v3863_v49  ;;  %vm2047_vm1 = vmor %vm2045_vm11, %vm2046_vm13 }
 0x785   : > { %v2001_v2 = vmul.f32 %v3897_v24, %v2000_v7  ;;  %v2088_v9 = vmul.f32 %v2018_v36, %v3599_v31  ;;  %v1806_v50 = vsel %vm1805_vm12, %v3857_v4, %v1802_v13  ;;  %2619 = vrsqrt.f32 %v3917_v16 }
 0x786   : > { %v2042_v33 = vmul.f32 0.5, %v2041_v19  ;;  %v1822_v22 = vmul.f32 %v1806_v50, %v3596_v40  ;;  %v1994_v12 = vmul.f32 %v3869_v42, %v1993_v53  ;;  %vm2005_vm14 = vweird.f32 %v3841_v25 }
 0x787   : > { %v2002_v38 = vmul.f32 0.5, %v2001_v2  ;;  %2104 = vst [vmem:[%s3647_s14 + $0x98] sm:$0xff] %v2088_v9  ;;  %v2021_v39 = vmul.f32 %v3908_v57, %v2020_v29  ;;  %vm2006_vm0 = vweird.f32 %v3897_v24  ;;  %v1916_v4 = vmax.f32 %v1898_v45, 1e-24 }
 0x788   : > { %v2043_v1 = vsub.f32 1.5, %v2042_v33  ;;  %v1900_v31 = vpop.xlane.xlu0 %1899  ;;  %1838 = vst [vmem:[%s3647_s14 + $0xf0] sm:$0xff] %v1822_v22  ;;  %v1998_v40 = vsel %vm1997_vm15, %v3869_v42, %v1994_v12  ;;  %vm2007_vm2 = vmor %vm2005_vm14, %vm2006_vm0  ;;  %vm2026_vm3 = vweird.f32 %v3908_v57  ;;  %vm2025_vm4 = vweird.f32 %v3863_v49 }
 0x789   : > { %v2618_v32 = vpop.eup %2617  ;;  %v2003_v43 = vsub.f32 1.5, %v2002_v38  ;;  %v2022_v18 = vmul.f32 0.5, %v2021_v39  ;;  %v3950_v14 = vmax.f32 %v1900_v31, 1e-24  ;;  %v2086_v54 = vmul.f32 %v1998_v40, %v3602_v62  ;;  %vm2027_vm5 = vmor %vm2025_vm4, %vm2026_vm3 }
 0x78a   : > { %v2044_v8 = vmul.f32 %v3883_v5, %v2043_v1  ;;  %v2070_v55 = vmul.f32 %v2618_v32, %v3892_v61  ;;  %2621 = vrsqrt.f32 %v1916_v4  ;;  %vm2076_vm6 = vweird.f32 %v2618_v32 }
 0x78b   : > { %v2004_v28 = vmul.f32 %v3897_v24, %v2003_v43  ;;  %v2023_v42 = vsub.f32 1.5, %v2022_v18  ;;  %v2620_v51 = vpop.eup %2619  ;;  %2102 = vst [vmem:[%s3647_s14 + $0x78] sm:$0xff] %v2086_v54  ;;  %2623 = vrsqrt.f32 %v3950_v14  ;;  %vm2075_vm7 = vweird.f32 %v3892_v61 }
 0x78c   : > { %v2048_v48 = vsel %vm2047_vm1, %v3883_v5, %v2044_v8  ;;  %v2071_v26 = vmul.f32 %v2618_v32, %v2070_v55  ;;  %v2030_v25 = vmul.f32 %v2620_v51, %v3917_v16  ;;  %vm2077_vm8 = vmor %vm2075_vm7, %vm2076_vm6  ;;  %vm2036_vm9 = vweird.f32 %v2620_v51 }
 0x78d   : > { %v2091_v23 = vmul.f32 %v2048_v48, %v3613_v15  ;;  %v2008_v59 = vsel %vm2007_vm2, %v3897_v24, %v2004_v28  ;;  %v2024_v15 = vmul.f32 %v3908_v57, %v2023_v42  ;;  %vm2035_vm10 = vweird.f32 %v3917_v16 }
 0x78e   : > { %v2072_v62 = vmul.f32 0.5, %v2071_v26  ;;  %v2087_v37 = vmul.f32 %v2008_v59, %v3611_v30  ;;  %v2031_v21 = vmul.f32 %v2620_v51, %v2030_v25  ;;  %vm2037_vm11 = vmor %vm2035_vm10, %vm2036_vm9  ;;  %vm2055_vm14 = vweird.f32 %v1916_v4 }
 0x78f   : > { %2107 = vst [vmem:[%s3647_s14 + $0xc8] sm:$0xff] %v2091_v23  ;;  %v2028_v11 = vsel %vm2027_vm5, %v3908_v57, %v2024_v15  ;;  %vm2065_vm0 = vweird.f32 %v3950_v14 }
 0x790   : > { %v2073_v46 = vsub.f32 1.5, %v2072_v62  ;;  %2103 = vst [vmem:[%s3647_s14 + $0x88] sm:$0xff] %v2087_v37  ;;  %v2089_v60 = vmul.f32 %v2028_v11, %v3616_v44  ;;  %v2622_v30 = vpop.eup %2621  ;;  %v2032_v47 = vmul.f32 0.5, %v2031_v21 }
 0x791   : > { %v2624_v49 = vpop.eup %2623  ;;  %v2050_v20 = vmul.f32 %v2622_v30, %v1916_v4  ;;  %vm2056_vm12 = vweird.f32 %v2622_v30 }
 0x792   : > { %v2074_v5 = vmul.f32 %v2618_v32, %v2073_v46  ;;  %2105 = vst [vmem:[%s3647_s14 + $0xa8] sm:$0xff] %v2089_v60  ;;  %v2033_v0 = vsub.f32 1.5, %v2032_v47  ;;  %v2060_v35 = vmul.f32 %v2624_v49, %v3950_v14  ;;  %vm2066_vm13 = vweird.f32 %v2624_v49  ;;  %vm2057_vm15 = vmor %vm2055_vm14, %vm2056_vm12 }
 0x793   : > { %v2051_v24 = vmul.f32 %v2622_v30, %v2050_v20  ;;  %vm2067_vm1 = vmor %vm2065_vm0, %vm2066_vm13 }
 0x794   : > { %v2078_v6 = vsel %vm2077_vm8, %v2618_v32, %v2074_v5  ;;  %v2034_v44 = vmul.f32 %v2620_v51, %v2033_v0  ;;  %v2061_v61 = vmul.f32 %v2624_v49, %v2060_v35 }
 0x795   : > { %v2094_v41 = vmul.f32 %v2078_v6, %v3626_v27  ;;  %v2052_v17 = vmul.f32 0.5, %v2051_v24 }
 0x796   : > { %v2038_v58 = vsel %vm2037_vm11, %v2620_v51, %v2034_v44  ;;  %v2062_v34 = vmul.f32 0.5, %v2061_v61 }
 0x797   : > { %2110 = vst [vmem:[%s3647_s14 + $0xf8] sm:$0xff] %v2094_v41  ;;  %v2090_v27 = vmul.f32 %v2038_v58, %v3624_v52  ;;  %v2053_v56 = vsub.f32 1.5, %v2052_v17 }
 0x798   : > { %v2063_v19 = vsub.f32 1.5, %v2062_v34 }
 0x799   : > { %2106 = vst [vmem:[%s3647_s14 + $0xb8] sm:$0xff] %v2090_v27  ;;  %v2054_v7 = vmul.f32 %v2622_v30, %v2053_v56 }
 0x79a   : > { %v2064_v57 = vmul.f32 %v2624_v49, %v2063_v19 }
 0x79b   : > { %v2058_v3 = vsel %vm2057_vm15, %v2622_v30, %v2054_v7 }
 0x79c   : > { %v2092_v52 = vmul.f32 %v2058_v3, %v3628_v10  ;;  %v2068_v16 = vsel %vm2067_vm1, %v2624_v49, %v2064_v57 }
 0x79d   : > { %v2093_v36 = vmul.f32 %v2068_v16, %v3636_v63 }
 0x79e   : > { %2108 = vst [vmem:[%s3647_s14 + $0xd8] sm:$0xff] %v2092_v52 }
 0x79f   : > { %2109 = vst [vmem:[%s3647_s14 + $0xe8] sm:$0xff] %v2093_v36 }
 0x7a0   : > { %2652 = shalt.err (!%p2649_p3)
}
 0x7a1   : > { %s2694_s11 = smov 256   ;;  %s2695_s14 = smov 16  }
 0x7a2   : > { %2363 = dma.vmem_to_hbm [thread:$0]  (%p2769_p5), %s2126_s25, 4096, %s2128_s19, %s2112_s28, %s2694_s11, %s2694_s11, %s2695_s14  }
 0x7a3 PF: > { %p2369_p4 = scmp.ge.s32.totalorder %s2687_s24, 2  ;;  %s2142_s15 = sand.u32 1, %s2675_s21  }
 0x7a4   : > { %s2143_s16 = scalar_lea.sflag [#allocation3], %s2142_s15 }
 0x7a5   : > { %p2366_p7 = pnand %p2369_p4, %p2773_p6 }
 0x7a7   : > { %p2367_p8 = pneg %p2366_p7 }
 0x7a9   : > { %2670 = dma.done.wait (%p2367_p8), %s2143_s16, 4096  }
 0x7aa   : > { %2672 = vsyncadd (%p2367_p8), %s2143_s16, 4294963200  ;;  %p16_p9 = scmp.ge.s32.totalorder %s2756_s27, 4   ;;  %s4049_s21 = smov %s2679_s22 }
 0x7ab   : > { %s4050_s22 = smov %s2683_s23  ;;  %s4051_s23 = smov %s2767_s30 }
 0x7ac   : > { %s4052_s24 = smov %s2756_s27  ;;  %18 = sbr.rel (!%p16_p9) target bundleno = 3 (0x3), region = 82 }
 0x7b1   :  { %2149 = vsyncpa [#allocation3], 1 }
 0x7b2   :  { %2151 = vsyncpa [#allocation3 + $0x1], 1 }

</bundles_post_ra>
